<compile_context>
chip_gen: v5e
topology: v5e:2x2
jax: 0.10.0
libtpu: 0.0.40
codegen_flags: <defaults>
</compile_context>

<pallas_src>
from functools import partial

import jax
import jax.numpy as jnp
import numpy as np
from jax.experimental import pallas as pl
from jax.experimental.pallas import tpu as pltpu


def basic_block_kernel(x_ref, w1_ref, s1_ref, b1_ref, w2_ref, s2_ref, b2_ref,
                       mask_ref, o_ref, y1p_scr, *, H, W):
    """Fused BasicBlock forward for one batch element.

    Activations live in a "channel-major, flat padded-width" layout:
        value[c, q],  q = y*(W+2) + x,  x in [0, W+2)  (x >= W are junk cols)
    so every 3x3 tap is a contiguous lane slice at offset ky*(W+2)+kx and the
    matmul / output lane dimension is the (large) pixel axis.

    x_ref   : (1, Cin, (H+3)*(W+2))  zero-padded input, f32 (halo baked in)
    w1_ref  : (C1, 9*Cin)            conv1 weights, rows ordered (ky,kx,cin), bf16
    s1_ref  : (C1, 1), b1_ref: (C1, 1)   folded bn1 scale / bias, f32
    w2_ref  : (C2, 9*C1)             conv2 weights, bf16
    s2_ref  : (C2, 1), b2_ref: (C2, 1)   folded bn2 scale / bias, f32
    mask_ref: (1, H*(W+2))           1.0 on valid columns, 0.0 on junk columns
    o_ref   : (1, C2, H*W)           output, f32 (lane-dense, NCHW-flat)
    y1p_scr : (C1, (H+3)*(W+2))      VMEM scratch: padded conv1 activation, f32
    """
    Wp = W + 2
    Mp = H * Wp
    padf = x_ref.shape[2]
    C1 = y1p_scr.shape[0]
    cdt = w1_ref.dtype  # bf16 MXU input dtype (f32 accumulation)

    def conv3x3(load_tap, w_ref):
        # Single deep-K MXU dot: K = 9*cin (all taps packed into the
        # contraction), lane/output dim = Mp (pixels), f32 accumulation.
        taps = [load_tap(ky * Wp + kx) for ky in range(3) for kx in range(3)]
        patch = jnp.concatenate(taps, axis=0).astype(cdt)      # (9*cin, Mp)
        return jnp.dot(w_ref[...], patch,
                       preferred_element_type=jnp.float32)     # (cout, Mp)

    # ---- conv1 + folded bn1 + ReLU (padded-width column domain) ----
    acc1 = conv3x3(lambda s: x_ref[0, :, s:s + Mp], w1_ref)
    y1 = jnp.maximum(acc1 * s1_ref[...] + b1_ref[...], 0.0)
    # Zero the junk columns: under the uniform shift below they land exactly on
    # the left/right halo columns of the conv2 source, which must stay zero.
    y1 = y1 * mask_ref[...]

    # Stash y1 as a zero-haloed padded image: valid column q -> position q+Wp+1
    # (one contiguous interior window store); only the two tiny top/bottom halo
    # strips are additionally written per step.  Every column of the scratch is
    # rewritten each step, so no cross-step state and no pl.when(step==0) init.
    y1p_scr[:, 0:Wp + 1] = jnp.zeros((C1, Wp + 1), y1p_scr.dtype)
    y1p_scr[:, Wp + 1:Wp + 1 + Mp] = y1
    y1p_scr[:, Wp + 1 + Mp:] = jnp.zeros((C1, padf - (Wp + 1 + Mp)),
                                         y1p_scr.dtype)

    # ---- conv2 + folded bn2 + residual (exact f32 identity) + ReLU ----
    acc2 = conv3x3(lambda s: y1p_scr[:, s:s + Mp], w2_ref)
    y2 = acc2 * s2_ref[...] + b2_ref[...]
    shortcut = x_ref[0, :, Wp + 1:Wp + 1 + Mp]                  # (Cin, Mp) f32
    out_q = jnp.maximum(y2 + shortcut, 0.0).astype(o_ref.dtype)

    # Compact padded-width rows -> dense H*W columns of the lane-dense output
    # block (the HBM writeback DMA of the block itself is fully dense).
    for y in range(H):
        o_ref[0, :, y * W:(y + 1) * W] = out_q[:, y * Wp:y * Wp + W]


def basic_block_forward(x_nchw, w1, scale1, bias1, w2, scale2, bias2):
    """BasicBlock forward (stride=1, no downsample), inference-mode BN.

    x_nchw: (N, Cin, H, W) f32.  w1: (3,3,Cin,C1) HWIO.  w2: (3,3,C1,C2) HWIO.
    scale*/bias*: folded BatchNorm per-channel scale/bias.
    Returns (N, C2, H, W) f32.
    """
    N, Cin, H, W = x_nchw.shape
    C1, C2 = w1.shape[3], w2.shape[3]
    assert C2 == Cin, "BasicBlock without downsample requires outplanes == inplanes"

    Wp = W + 2
    Mp = H * Wp
    padf = (H + 3) * Wp                  # +1 spare zero row for the (2,2) tap
    cdt = jnp.bfloat16

    # Zero halo baked into the input via a layout-preserving pad (replaces the
    # previous NCHW->NHWC transpose); the trailing reshape is metadata-only.
    xpad = jnp.pad(x_nchw.astype(jnp.float32),
                   ((0, 0), (0, 0), (1, 2), (1, 1))).reshape(N, Cin, padf)

    # (3,3,Cin,C) HWIO -> (Cout, 9*Cin): contraction rows ordered (ky, kx, cin)
    # to match the kernel's tap order; pre-transposed so the MXU output lane
    # dimension is the pixel axis.
    w1t = jnp.transpose(w1.reshape(9 * Cin, C1)).astype(cdt)
    w2t = jnp.transpose(w2.reshape(9 * C1, C2)).astype(cdt)
    s1 = scale1.reshape(C1, 1).astype(jnp.float32)
    b1 = bias1.reshape(C1, 1).astype(jnp.float32)
    s2 = scale2.reshape(C2, 1).astype(jnp.float32)
    b2 = bias2.reshape(C2, 1).astype(jnp.float32)
    # 1.0 on valid (x < W) columns of the padded-width pixel axis, 0.0 on junk.
    mask = (jnp.arange(Mp, dtype=jnp.int32) % Wp < W).astype(jnp.float32)
    mask = mask.reshape(1, Mp)

    flops = N * 2 * 9 * H * W * (Cin * C1 + C1 * C2)
    bytes_accessed = int(
        N * Cin * padf * 4              # f32 padded input
        + N * C2 * H * W * 4            # f32 output
        + (w1t.size + w2t.size) * 2     # bf16 weights
        + (s1.size + b1.size + s2.size + b2.size + mask.size) * 4)

    out_flat = pl.pallas_call(
        partial(basic_block_kernel, H=H, W=W),
        out_shape=jax.ShapeDtypeStruct((N, C2, H * W), jnp.float32),
        grid_spec=pltpu.PrefetchScalarGridSpec(
            num_scalar_prefetch=0,
            grid=(N,),
            in_specs=[
                pl.BlockSpec((1, Cin, padf), lambda b: (b, 0, 0)),
                # Grid-invariant operands (constant index maps).
                # TODO(synk): pipeline_mode=pl.Buffered(1) to single-buffer
                # these and save VMEM at large C.
                pl.BlockSpec((C1, 9 * Cin), lambda b: (0, 0)),
                pl.BlockSpec((C1, 1), lambda b: (0, 0)),
                pl.BlockSpec((C1, 1), lambda b: (0, 0)),
                pl.BlockSpec((C2, 9 * C1), lambda b: (0, 0)),
                pl.BlockSpec((C2, 1), lambda b: (0, 0)),
                pl.BlockSpec((C2, 1), lambda b: (0, 0)),
                pl.BlockSpec((1, Mp), lambda b: (0, 0)),
            ],
            out_specs=pl.BlockSpec((1, C2, H * W), lambda b: (b, 0, 0)),
            scratch_shapes=[pltpu.VMEM((C1, padf), jnp.float32)],
        ),
        compiler_params=pltpu.CompilerParams(
            dimension_semantics=("parallel",),      # batch shards across TCs
            vmem_limit_bytes=32 * 1024 * 1024),
        cost_estimate=pl.CostEstimate(
            flops=flops, transcendentals=0, bytes_accessed=bytes_accessed),
    )(xpad, w1t, s1, b1, w2t, s2, b2, mask)

    # Metadata-only reshape back to NCHW (no transpose / HBM pass).
    return out_flat.reshape(N, C2, H, W)


# ----------------------------- reference ------------------------------------

def _conv3x3_ref(x_nchw, w_hwio):
    w_oihw = jnp.transpose(w_hwio, (3, 2, 0, 1))
    return jax.lax.conv_general_dilated(
        x_nchw, w_oihw, window_strides=(1, 1), padding=((1, 1), (1, 1)),
        dimension_numbers=("NCHW", "OIHW", "NCHW"),
        precision=jax.lax.Precision.HIGHEST)


def _reference(x, w1, s1, b1, w2, s2, b2):
    # Mirror the kernel's bf16 rounding of MXU inputs (accumulation stays f32 in
    # both paths); the residual uses the exact f32 identity, as in the kernel.
    bf = lambda a: a.astype(jnp.bfloat16).astype(jnp.float32)
    y = _conv3x3_ref(bf(x), bf(w1))
    y = jnp.maximum(y * s1[None, :, None, None] + b1[None, :, None, None], 0.0)
    y = _conv3x3_ref(bf(y), bf(w2))
    y = y * s2[None, :, None, None] + b2[None, :, None, None]
    return jnp.maximum(y + x, 0.0)


if __name__ == "__main__":
    # BasicBlock(inplanes=4, planes=4, stride=1, downsample=None)
    N, C, H, W = 2, 4, 16, 16
    key = jax.random.PRNGKey(0)
    kx, kw1, kw2, kg1, kb1, kg2, kb2 = jax.random.split(key, 7)

    x = jax.random.normal(kx, (N, C, H, W), jnp.float32)
    w1 = 0.1 * jax.random.normal(kw1, (3, 3, C, C), jnp.float32)  # HWIO
    w2 = 0.1 * jax.random.normal(kw2, (3, 3, C, C), jnp.float32)  # HWIO

    # BatchNorm params (inference mode: running_mean=0, running_var=1)
    eps = 1e-5
    gamma1 = 1.0 + 0.1 * jax.random.normal(kg1, (C,), jnp.float32)
    beta1 = 0.1 * jax.random.normal(kb1, (C,), jnp.float32)
    gamma2 = 1.0 + 0.1 * jax.random.normal(kg2, (C,), jnp.float32)
    beta2 = 0.1 * jax.random.normal(kb2, (C,), jnp.float32)
    run_mean = jnp.zeros((C,), jnp.float32)
    run_var = jnp.ones((C,), jnp.float32)

    scale1 = gamma1 / jnp.sqrt(run_var + eps)
    bias1 = beta1 - run_mean * scale1
    scale2 = gamma2 / jnp.sqrt(run_var + eps)
    bias2 = beta2 - run_mean * scale2

    out = basic_block_forward(x, w1, scale1, bias1, w2, scale2, bias2)
    out = jax.block_until_ready(out)

    ref = _reference(x, w1, scale1, bias1, w2, scale2, bias2)
    np.testing.assert_allclose(np.asarray(out), np.asarray(ref),
                               rtol=1e-3, atol=1e-3)
    print("KERNEL_OK")
</pallas_src>

<mosaic_0001>
module attributes {stable_mosaic.version = 11 : i64} {
  func.func @basic_block_kernel(%arg0: i32, %arg1: memref<1x4x342xf32, #tpu.memory_space<vmem>>, %arg2: memref<4x36xbf16, #tpu.memory_space<vmem>>, %arg3: memref<4x1xf32, #tpu.memory_space<vmem>>, %arg4: memref<4x1xf32, #tpu.memory_space<vmem>>, %arg5: memref<4x36xbf16, #tpu.memory_space<vmem>>, %arg6: memref<4x1xf32, #tpu.memory_space<vmem>>, %arg7: memref<4x1xf32, #tpu.memory_space<vmem>>, %arg8: memref<1x288xf32, #tpu.memory_space<vmem>>, %arg9: memref<1x4x256xf32, #tpu.memory_space<vmem>>, %arg10: memref<4x342xf32, #tpu.memory_space<vmem>>) attributes {dimension_semantics = [#tpu.dimension_semantics<parallel>], iteration_bounds = array<i64: 2>, scalar_prefetch = 0 : i64, scratch_operands = 1 : i64, tpu.core_type = #tpu.core_type<tc>, window_params = [{transform_indices = @transform_0, window_bounds = array<i64: 1, 4, 342>}, {pipeline_mode = #tpu.pipeline_mode<synchronous>, transform_indices = @transform_1, window_bounds = array<i64: 4, 36>}, {pipeline_mode = #tpu.pipeline_mode<synchronous>, transform_indices = @transform_2, window_bounds = array<i64: 4, 1>}, {pipeline_mode = #tpu.pipeline_mode<synchronous>, transform_indices = @transform_3, window_bounds = array<i64: 4, 1>}, {pipeline_mode = #tpu.pipeline_mode<synchronous>, transform_indices = @transform_4, window_bounds = array<i64: 4, 36>}, {pipeline_mode = #tpu.pipeline_mode<synchronous>, transform_indices = @transform_5, window_bounds = array<i64: 4, 1>}, {pipeline_mode = #tpu.pipeline_mode<synchronous>, transform_indices = @transform_6, window_bounds = array<i64: 4, 1>}, {pipeline_mode = #tpu.pipeline_mode<synchronous>, transform_indices = @transform_7, window_bounds = array<i64: 1, 288>}, {transform_indices = @transform_8, window_bounds = array<i64: 1, 4, 256>}]} {
    %c0 = arith.constant 0 : index
    %c0_0 = arith.constant 0 : index
    %c0_1 = arith.constant 0 : index
    %0 = vector.load %arg1[%c0, %c0_0, %c0_1] : memref<1x4x342xf32, #tpu.memory_space<vmem>>, vector<1x4x288xf32>
    %1 = vector.shape_cast %0 : vector<1x4x288xf32> to vector<4x288xf32>
    %c0_2 = arith.constant 0 : index
    %c0_3 = arith.constant 0 : index
    %c1 = arith.constant 1 : index
    %2 = vector.load %arg1[%c0_2, %c0_3, %c1] : memref<1x4x342xf32, #tpu.memory_space<vmem>>, vector<1x4x288xf32>
    %3 = vector.shape_cast %2 : vector<1x4x288xf32> to vector<4x288xf32>
    %c0_4 = arith.constant 0 : index
    %c0_5 = arith.constant 0 : index
    %c2 = arith.constant 2 : index
    %4 = vector.load %arg1[%c0_4, %c0_5, %c2] : memref<1x4x342xf32, #tpu.memory_space<vmem>>, vector<1x4x288xf32>
    %5 = vector.shape_cast %4 : vector<1x4x288xf32> to vector<4x288xf32>
    %c0_6 = arith.constant 0 : index
    %c0_7 = arith.constant 0 : index
    %c18 = arith.constant 18 : index
    %6 = vector.load %arg1[%c0_6, %c0_7, %c18] : memref<1x4x342xf32, #tpu.memory_space<vmem>>, vector<1x4x288xf32>
    %7 = vector.shape_cast %6 : vector<1x4x288xf32> to vector<4x288xf32>
    %c0_8 = arith.constant 0 : index
    %c0_9 = arith.constant 0 : index
    %c19 = arith.constant 19 : index
    %8 = vector.load %arg1[%c0_8, %c0_9, %c19] : memref<1x4x342xf32, #tpu.memory_space<vmem>>, vector<1x4x288xf32>
    %9 = vector.shape_cast %8 : vector<1x4x288xf32> to vector<4x288xf32>
    %c0_10 = arith.constant 0 : index
    %c0_11 = arith.constant 0 : index
    %c20 = arith.constant 20 : index
    %10 = vector.load %arg1[%c0_10, %c0_11, %c20] : memref<1x4x342xf32, #tpu.memory_space<vmem>>, vector<1x4x288xf32>
    %11 = vector.shape_cast %10 : vector<1x4x288xf32> to vector<4x288xf32>
    %c0_12 = arith.constant 0 : index
    %c0_13 = arith.constant 0 : index
    %c36 = arith.constant 36 : index
    %12 = vector.load %arg1[%c0_12, %c0_13, %c36] : memref<1x4x342xf32, #tpu.memory_space<vmem>>, vector<1x4x288xf32>
    %13 = vector.shape_cast %12 : vector<1x4x288xf32> to vector<4x288xf32>
    %c0_14 = arith.constant 0 : index
    %c0_15 = arith.constant 0 : index
    %c37 = arith.constant 37 : index
    %14 = vector.load %arg1[%c0_14, %c0_15, %c37] : memref<1x4x342xf32, #tpu.memory_space<vmem>>, vector<1x4x288xf32>
    %15 = vector.shape_cast %14 : vector<1x4x288xf32> to vector<4x288xf32>
    %c0_16 = arith.constant 0 : index
    %c0_17 = arith.constant 0 : index
    %c38 = arith.constant 38 : index
    %16 = vector.load %arg1[%c0_16, %c0_17, %c38] : memref<1x4x342xf32, #tpu.memory_space<vmem>>, vector<1x4x288xf32>
    %17 = vector.shape_cast %16 : vector<1x4x288xf32> to vector<4x288xf32>
    %18 = tpu.concatenate %1, %3, %5, %7, %9, %11, %13, %15, %17 in 0 : vector<4x288xf32>, vector<4x288xf32>, vector<4x288xf32>, vector<4x288xf32>, vector<4x288xf32>, vector<4x288xf32>, vector<4x288xf32>, vector<4x288xf32>, vector<4x288xf32> -> vector<36x288xf32>
    %19 = arith.truncf %18 : vector<36x288xf32> to vector<36x288xbf16>
    %c0_18 = arith.constant 0 : index
    %c0_19 = arith.constant 0 : index
    %20 = vector.load %arg2[%c0_18, %c0_19] : memref<4x36xbf16, #tpu.memory_space<vmem>>, vector<4x36xbf16>
    %cst = arith.constant dense<0.000000e+00> : vector<4x288xf32>
    %21 = tpu.matmul %20, %19, %cst {dimension_numbers = #tpu.dot_dimension_numbers<[1], [0], [0], [1], [0, 0, 1, 1], [], []>} : vector<4x36xbf16>, vector<36x288xbf16>, vector<4x288xf32> -> vector<4x288xf32>
    %c0_20 = arith.constant 0 : index
    %c0_21 = arith.constant 0 : index
    %22 = vector.load %arg3[%c0_20, %c0_21] : memref<4x1xf32, #tpu.memory_space<vmem>>, vector<4x1xf32>
    %23 = vector.broadcast %22 : vector<4x1xf32> to vector<4x288xf32>
    %24 = arith.mulf %21, %23 : vector<4x288xf32>
    %c0_22 = arith.constant 0 : index
    %c0_23 = arith.constant 0 : index
    %25 = vector.load %arg4[%c0_22, %c0_23] : memref<4x1xf32, #tpu.memory_space<vmem>>, vector<4x1xf32>
    %26 = vector.broadcast %25 : vector<4x1xf32> to vector<4x288xf32>
    %27 = arith.addf %24, %26 : vector<4x288xf32>
    %cst_24 = arith.constant 0.000000e+00 : f32
    %28 = vector.broadcast %cst_24 : f32 to vector<4x288xf32>
    %29 = arith.maximumf %27, %28 : vector<4x288xf32>
    %c0_25 = arith.constant 0 : index
    %c0_26 = arith.constant 0 : index
    %30 = vector.load %arg8[%c0_25, %c0_26] : memref<1x288xf32, #tpu.memory_space<vmem>>, vector<1x288xf32>
    %31 = vector.broadcast %30 : vector<1x288xf32> to vector<4x288xf32>
    %32 = arith.mulf %29, %31 : vector<4x288xf32>
    %cst_27 = arith.constant 0.000000e+00 : f32
    %33 = vector.broadcast %cst_27 : f32 to vector<4x19xf32>
    %c0_28 = arith.constant 0 : index
    %c0_29 = arith.constant 0 : index
    %34 = vector.load %arg10[%c0_28, %c0_29] : memref<4x342xf32, #tpu.memory_space<vmem>>, vector<4x19xf32>
    tpu.vector_store %arg10[%c0_28, %c0_29], %33 {strides = array<i32>} : memref<4x342xf32, #tpu.memory_space<vmem>>, vector<4x19xf32>,
    %c0_30 = arith.constant 0 : index
    %c19_31 = arith.constant 19 : index
    %35 = vector.load %arg10[%c0_30, %c19_31] : memref<4x342xf32, #tpu.memory_space<vmem>>, vector<4x288xf32>
    tpu.vector_store %arg10[%c0_30, %c19_31], %32 {strides = array<i32>} : memref<4x342xf32, #tpu.memory_space<vmem>>, vector<4x288xf32>,
    %cst_32 = arith.constant 0.000000e+00 : f32
    %36 = vector.broadcast %cst_32 : f32 to vector<4x35xf32>
    %c0_33 = arith.constant 0 : index
    %c307 = arith.constant 307 : index
    %37 = vector.load %arg10[%c0_33, %c307] : memref<4x342xf32, #tpu.memory_space<vmem>>, vector<4x35xf32>
    tpu.vector_store %arg10[%c0_33, %c307], %36 {strides = array<i32>} : memref<4x342xf32, #tpu.memory_space<vmem>>, vector<4x35xf32>,
    %c0_34 = arith.constant 0 : index
    %c0_35 = arith.constant 0 : index
    %38 = vector.load %arg10[%c0_34, %c0_35] : memref<4x342xf32, #tpu.memory_space<vmem>>, vector<4x288xf32>
    %c0_36 = arith.constant 0 : index
    %c1_37 = arith.constant 1 : index
    %39 = vector.load %arg10[%c0_36, %c1_37] : memref<4x342xf32, #tpu.memory_space<vmem>>, vector<4x288xf32>
    %c0_38 = arith.constant 0 : index
    %c2_39 = arith.constant 2 : index
    %40 = vector.load %arg10[%c0_38, %c2_39] : memref<4x342xf32, #tpu.memory_space<vmem>>, vector<4x288xf32>
    %c0_40 = arith.constant 0 : index
    %c18_41 = arith.constant 18 : index
    %41 = vector.load %arg10[%c0_40, %c18_41] : memref<4x342xf32, #tpu.memory_space<vmem>>, vector<4x288xf32>
    %c0_42 = arith.constant 0 : index
    %c19_43 = arith.constant 19 : index
    %42 = vector.load %arg10[%c0_42, %c19_43] : memref<4x342xf32, #tpu.memory_space<vmem>>, vector<4x288xf32>
    %c0_44 = arith.constant 0 : index
    %c20_45 = arith.constant 20 : index
    %43 = vector.load %arg10[%c0_44, %c20_45] : memref<4x342xf32, #tpu.memory_space<vmem>>, vector<4x288xf32>
    %c0_46 = arith.constant 0 : index
    %c36_47 = arith.constant 36 : index
    %44 = vector.load %arg10[%c0_46, %c36_47] : memref<4x342xf32, #tpu.memory_space<vmem>>, vector<4x288xf32>
    %c0_48 = arith.constant 0 : index
    %c37_49 = arith.constant 37 : index
    %45 = vector.load %arg10[%c0_48, %c37_49] : memref<4x342xf32, #tpu.memory_space<vmem>>, vector<4x288xf32>
    %c0_50 = arith.constant 0 : index
    %c38_51 = arith.constant 38 : index
    %46 = vector.load %arg10[%c0_50, %c38_51] : memref<4x342xf32, #tpu.memory_space<vmem>>, vector<4x288xf32>
    %47 = tpu.concatenate %38, %39, %40, %41, %42, %43, %44, %45, %46 in 0 : vector<4x288xf32>, vector<4x288xf32>, vector<4x288xf32>, vector<4x288xf32>, vector<4x288xf32>, vector<4x288xf32>, vector<4x288xf32>, vector<4x288xf32>, vector<4x288xf32> -> vector<36x288xf32>
    %48 = arith.truncf %47 : vector<36x288xf32> to vector<36x288xbf16>
    %c0_52 = arith.constant 0 : index
    %c0_53 = arith.constant 0 : index
    %49 = vector.load %arg5[%c0_52, %c0_53] : memref<4x36xbf16, #tpu.memory_space<vmem>>, vector<4x36xbf16>
    %cst_54 = arith.constant dense<0.000000e+00> : vector<4x288xf32>
    %50 = tpu.matmul %49, %48, %cst_54 {dimension_numbers = #tpu.dot_dimension_numbers<[1], [0], [0], [1], [0, 0, 1, 1], [], []>} : vector<4x36xbf16>, vector<36x288xbf16>, vector<4x288xf32> -> vector<4x288xf32>
    %c0_55 = arith.constant 0 : index
    %c0_56 = arith.constant 0 : index
    %51 = vector.load %arg6[%c0_55, %c0_56] : memref<4x1xf32, #tpu.memory_space<vmem>>, vector<4x1xf32>
    %52 = vector.broadcast %51 : vector<4x1xf32> to vector<4x288xf32>
    %53 = arith.mulf %50, %52 : vector<4x288xf32>
    %c0_57 = arith.constant 0 : index
    %c0_58 = arith.constant 0 : index
    %54 = vector.load %arg7[%c0_57, %c0_58] : memref<4x1xf32, #tpu.memory_space<vmem>>, vector<4x1xf32>
    %55 = vector.broadcast %54 : vector<4x1xf32> to vector<4x288xf32>
    %56 = arith.addf %53, %55 : vector<4x288xf32>
    %c0_59 = arith.constant 0 : index
    %c0_60 = arith.constant 0 : index
    %c19_61 = arith.constant 19 : index
    %57 = vector.load %arg1[%c0_59, %c0_60, %c19_61] : memref<1x4x342xf32, #tpu.memory_space<vmem>>, vector<1x4x288xf32>
    %58 = vector.shape_cast %57 : vector<1x4x288xf32> to vector<4x288xf32>
    %59 = arith.addf %56, %58 : vector<4x288xf32>
    %cst_62 = arith.constant 0.000000e+00 : f32
    %60 = vector.broadcast %cst_62 : f32 to vector<4x288xf32>
    %61 = arith.maximumf %59, %60 : vector<4x288xf32>
    %62 = vector.extract_strided_slice %61 {offsets = [0, 0], sizes = [4, 16], strides = [1, 1]} : vector<4x288xf32> to vector<4x16xf32>
    %c0_63 = arith.constant 0 : index
    %c0_64 = arith.constant 0 : index
    %c0_65 = arith.constant 0 : index
    %63 = vector.load %arg9[%c0_63, %c0_64, %c0_65] : memref<1x4x256xf32, #tpu.memory_space<vmem>>, vector<1x4x16xf32>
    %64 = vector.shape_cast %63 : vector<1x4x16xf32> to vector<4x16xf32>
    %65 = vector.shape_cast %62 : vector<4x16xf32> to vector<1x4x16xf32>
    tpu.vector_store %arg9[%c0_63, %c0_64, %c0_65], %65 {strides = array<i32>} : memref<1x4x256xf32, #tpu.memory_space<vmem>>, vector<1x4x16xf32>,
    %66 = vector.extract_strided_slice %61 {offsets = [0, 18], sizes = [4, 16], strides = [1, 1]} : vector<4x288xf32> to vector<4x16xf32>
    %c0_66 = arith.constant 0 : index
    %c0_67 = arith.constant 0 : index
    %c16 = arith.constant 16 : index
    %67 = vector.load %arg9[%c0_66, %c0_67, %c16] : memref<1x4x256xf32, #tpu.memory_space<vmem>>, vector<1x4x16xf32>
    %68 = vector.shape_cast %67 : vector<1x4x16xf32> to vector<4x16xf32>
    %69 = vector.shape_cast %66 : vector<4x16xf32> to vector<1x4x16xf32>
    tpu.vector_store %arg9[%c0_66, %c0_67, %c16], %69 {strides = array<i32>} : memref<1x4x256xf32, #tpu.memory_space<vmem>>, vector<1x4x16xf32>,
    %70 = vector.extract_strided_slice %61 {offsets = [0, 36], sizes = [4, 16], strides = [1, 1]} : vector<4x288xf32> to vector<4x16xf32>
    %c0_68 = arith.constant 0 : index
    %c0_69 = arith.constant 0 : index
    %c32 = arith.constant 32 : index
    %71 = vector.load %arg9[%c0_68, %c0_69, %c32] : memref<1x4x256xf32, #tpu.memory_space<vmem>>, vector<1x4x16xf32>
    %72 = vector.shape_cast %71 : vector<1x4x16xf32> to vector<4x16xf32>
    %73 = vector.shape_cast %70 : vector<4x16xf32> to vector<1x4x16xf32>
    tpu.vector_store %arg9[%c0_68, %c0_69, %c32], %73 {strides = array<i32>} : memref<1x4x256xf32, #tpu.memory_space<vmem>>, vector<1x4x16xf32>,
    %74 = vector.extract_strided_slice %61 {offsets = [0, 54], sizes = [4, 16], strides = [1, 1]} : vector<4x288xf32> to vector<4x16xf32>
    %c0_70 = arith.constant 0 : index
    %c0_71 = arith.constant 0 : index
    %c48 = arith.constant 48 : index
    %75 = vector.load %arg9[%c0_70, %c0_71, %c48] : memref<1x4x256xf32, #tpu.memory_space<vmem>>, vector<1x4x16xf32>
    %76 = vector.shape_cast %75 : vector<1x4x16xf32> to vector<4x16xf32>
    %77 = vector.shape_cast %74 : vector<4x16xf32> to vector<1x4x16xf32>
    tpu.vector_store %arg9[%c0_70, %c0_71, %c48], %77 {strides = array<i32>} : memref<1x4x256xf32, #tpu.memory_space<vmem>>, vector<1x4x16xf32>,
    %78 = vector.extract_strided_slice %61 {offsets = [0, 72], sizes = [4, 16], strides = [1, 1]} : vector<4x288xf32> to vector<4x16xf32>
    %c0_72 = arith.constant 0 : index
    %c0_73 = arith.constant 0 : index
    %c64 = arith.constant 64 : index
    %79 = vector.load %arg9[%c0_72, %c0_73, %c64] : memref<1x4x256xf32, #tpu.memory_space<vmem>>, vector<1x4x16xf32>
    %80 = vector.shape_cast %79 : vector<1x4x16xf32> to vector<4x16xf32>
    %81 = vector.shape_cast %78 : vector<4x16xf32> to vector<1x4x16xf32>
    tpu.vector_store %arg9[%c0_72, %c0_73, %c64], %81 {strides = array<i32>} : memref<1x4x256xf32, #tpu.memory_space<vmem>>, vector<1x4x16xf32>,
    %82 = vector.extract_strided_slice %61 {offsets = [0, 90], sizes = [4, 16], strides = [1, 1]} : vector<4x288xf32> to vector<4x16xf32>
    %c0_74 = arith.constant 0 : index
    %c0_75 = arith.constant 0 : index
    %c80 = arith.constant 80 : index
    %83 = vector.load %arg9[%c0_74, %c0_75, %c80] : memref<1x4x256xf32, #tpu.memory_space<vmem>>, vector<1x4x16xf32>
    %84 = vector.shape_cast %83 : vector<1x4x16xf32> to vector<4x16xf32>
    %85 = vector.shape_cast %82 : vector<4x16xf32> to vector<1x4x16xf32>
    tpu.vector_store %arg9[%c0_74, %c0_75, %c80], %85 {strides = array<i32>} : memref<1x4x256xf32, #tpu.memory_space<vmem>>, vector<1x4x16xf32>,
    %86 = vector.extract_strided_slice %61 {offsets = [0, 108], sizes = [4, 16], strides = [1, 1]} : vector<4x288xf32> to vector<4x16xf32>
    %c0_76 = arith.constant 0 : index
    %c0_77 = arith.constant 0 : index
    %c96 = arith.constant 96 : index
    %87 = vector.load %arg9[%c0_76, %c0_77, %c96] : memref<1x4x256xf32, #tpu.memory_space<vmem>>, vector<1x4x16xf32>
    %88 = vector.shape_cast %87 : vector<1x4x16xf32> to vector<4x16xf32>
    %89 = vector.shape_cast %86 : vector<4x16xf32> to vector<1x4x16xf32>
    tpu.vector_store %arg9[%c0_76, %c0_77, %c96], %89 {strides = array<i32>} : memref<1x4x256xf32, #tpu.memory_space<vmem>>, vector<1x4x16xf32>,
    %90 = vector.extract_strided_slice %61 {offsets = [0, 126], sizes = [4, 16], strides = [1, 1]} : vector<4x288xf32> to vector<4x16xf32>
    %c0_78 = arith.constant 0 : index
    %c0_79 = arith.constant 0 : index
    %c112 = arith.constant 112 : index
    %91 = vector.load %arg9[%c0_78, %c0_79, %c112] : memref<1x4x256xf32, #tpu.memory_space<vmem>>, vector<1x4x16xf32>
    %92 = vector.shape_cast %91 : vector<1x4x16xf32> to vector<4x16xf32>
    %93 = vector.shape_cast %90 : vector<4x16xf32> to vector<1x4x16xf32>
    tpu.vector_store %arg9[%c0_78, %c0_79, %c112], %93 {strides = array<i32>} : memref<1x4x256xf32, #tpu.memory_space<vmem>>, vector<1x4x16xf32>,
    %94 = vector.extract_strided_slice %61 {offsets = [0, 144], sizes = [4, 16], strides = [1, 1]} : vector<4x288xf32> to vector<4x16xf32>
    %c0_80 = arith.constant 0 : index
    %c0_81 = arith.constant 0 : index
    %c128 = arith.constant 128 : index
    %95 = vector.load %arg9[%c0_80, %c0_81, %c128] : memref<1x4x256xf32, #tpu.memory_space<vmem>>, vector<1x4x16xf32>
    %96 = vector.shape_cast %95 : vector<1x4x16xf32> to vector<4x16xf32>
    %97 = vector.shape_cast %94 : vector<4x16xf32> to vector<1x4x16xf32>
    tpu.vector_store %arg9[%c0_80, %c0_81, %c128], %97 {strides = array<i32>} : memref<1x4x256xf32, #tpu.memory_space<vmem>>, vector<1x4x16xf32>,
    %98 = vector.extract_strided_slice %61 {offsets = [0, 162], sizes = [4, 16], strides = [1, 1]} : vector<4x288xf32> to vector<4x16xf32>
    %c0_82 = arith.constant 0 : index
    %c0_83 = arith.constant 0 : index
    %c144 = arith.constant 144 : index
    %99 = vector.load %arg9[%c0_82, %c0_83, %c144] : memref<1x4x256xf32, #tpu.memory_space<vmem>>, vector<1x4x16xf32>
    %100 = vector.shape_cast %99 : vector<1x4x16xf32> to vector<4x16xf32>
    %101 = vector.shape_cast %98 : vector<4x16xf32> to vector<1x4x16xf32>
    tpu.vector_store %arg9[%c0_82, %c0_83, %c144], %101 {strides = array<i32>} : memref<1x4x256xf32, #tpu.memory_space<vmem>>, vector<1x4x16xf32>,
    %102 = vector.extract_strided_slice %61 {offsets = [0, 180], sizes = [4, 16], strides = [1, 1]} : vector<4x288xf32> to vector<4x16xf32>
    %c0_84 = arith.constant 0 : index
    %c0_85 = arith.constant 0 : index
    %c160 = arith.constant 160 : index
    %103 = vector.load %arg9[%c0_84, %c0_85, %c160] : memref<1x4x256xf32, #tpu.memory_space<vmem>>, vector<1x4x16xf32>
    %104 = vector.shape_cast %103 : vector<1x4x16xf32> to vector<4x16xf32>
    %105 = vector.shape_cast %102 : vector<4x16xf32> to vector<1x4x16xf32>
    tpu.vector_store %arg9[%c0_84, %c0_85, %c160], %105 {strides = array<i32>} : memref<1x4x256xf32, #tpu.memory_space<vmem>>, vector<1x4x16xf32>,
    %106 = vector.extract_strided_slice %61 {offsets = [0, 198], sizes = [4, 16], strides = [1, 1]} : vector<4x288xf32> to vector<4x16xf32>
    %c0_86 = arith.constant 0 : index
    %c0_87 = arith.constant 0 : index
    %c176 = arith.constant 176 : index
    %107 = vector.load %arg9[%c0_86, %c0_87, %c176] : memref<1x4x256xf32, #tpu.memory_space<vmem>>, vector<1x4x16xf32>
    %108 = vector.shape_cast %107 : vector<1x4x16xf32> to vector<4x16xf32>
    %109 = vector.shape_cast %106 : vector<4x16xf32> to vector<1x4x16xf32>
    tpu.vector_store %arg9[%c0_86, %c0_87, %c176], %109 {strides = array<i32>} : memref<1x4x256xf32, #tpu.memory_space<vmem>>, vector<1x4x16xf32>,
    %110 = vector.extract_strided_slice %61 {offsets = [0, 216], sizes = [4, 16], strides = [1, 1]} : vector<4x288xf32> to vector<4x16xf32>
    %c0_88 = arith.constant 0 : index
    %c0_89 = arith.constant 0 : index
    %c192 = arith.constant 192 : index
    %111 = vector.load %arg9[%c0_88, %c0_89, %c192] : memref<1x4x256xf32, #tpu.memory_space<vmem>>, vector<1x4x16xf32>
    %112 = vector.shape_cast %111 : vector<1x4x16xf32> to vector<4x16xf32>
    %113 = vector.shape_cast %110 : vector<4x16xf32> to vector<1x4x16xf32>
    tpu.vector_store %arg9[%c0_88, %c0_89, %c192], %113 {strides = array<i32>} : memref<1x4x256xf32, #tpu.memory_space<vmem>>, vector<1x4x16xf32>,
    %114 = vector.extract_strided_slice %61 {offsets = [0, 234], sizes = [4, 16], strides = [1, 1]} : vector<4x288xf32> to vector<4x16xf32>
    %c0_90 = arith.constant 0 : index
    %c0_91 = arith.constant 0 : index
    %c208 = arith.constant 208 : index
    %115 = vector.load %arg9[%c0_90, %c0_91, %c208] : memref<1x4x256xf32, #tpu.memory_space<vmem>>, vector<1x4x16xf32>
    %116 = vector.shape_cast %115 : vector<1x4x16xf32> to vector<4x16xf32>
    %117 = vector.shape_cast %114 : vector<4x16xf32> to vector<1x4x16xf32>
    tpu.vector_store %arg9[%c0_90, %c0_91, %c208], %117 {strides = array<i32>} : memref<1x4x256xf32, #tpu.memory_space<vmem>>, vector<1x4x16xf32>,
    %118 = vector.extract_strided_slice %61 {offsets = [0, 252], sizes = [4, 16], strides = [1, 1]} : vector<4x288xf32> to vector<4x16xf32>
    %c0_92 = arith.constant 0 : index
    %c0_93 = arith.constant 0 : index
    %c224 = arith.constant 224 : index
    %119 = vector.load %arg9[%c0_92, %c0_93, %c224] : memref<1x4x256xf32, #tpu.memory_space<vmem>>, vector<1x4x16xf32>
    %120 = vector.shape_cast %119 : vector<1x4x16xf32> to vector<4x16xf32>
    %121 = vector.shape_cast %118 : vector<4x16xf32> to vector<1x4x16xf32>
    tpu.vector_store %arg9[%c0_92, %c0_93, %c224], %121 {strides = array<i32>} : memref<1x4x256xf32, #tpu.memory_space<vmem>>, vector<1x4x16xf32>,
    %122 = vector.extract_strided_slice %61 {offsets = [0, 270], sizes = [4, 16], strides = [1, 1]} : vector<4x288xf32> to vector<4x16xf32>
    %c0_94 = arith.constant 0 : index
    %c0_95 = arith.constant 0 : index
    %c240 = arith.constant 240 : index
    %123 = vector.load %arg9[%c0_94, %c0_95, %c240] : memref<1x4x256xf32, #tpu.memory_space<vmem>>, vector<1x4x16xf32>
    %124 = vector.shape_cast %123 : vector<1x4x16xf32> to vector<4x16xf32>
    %125 = vector.shape_cast %122 : vector<4x16xf32> to vector<1x4x16xf32>
    tpu.vector_store %arg9[%c0_94, %c0_95, %c240], %125 {strides = array<i32>} : memref<1x4x256xf32, #tpu.memory_space<vmem>>, vector<1x4x16xf32>,
    return
  }
  func.func @transform_0(%arg0: i32) -> (i32, i32, i32) {
    %c0_i32 = arith.constant 0 : i32
    %c0_i32_0 = arith.constant 0 : i32
    %c0_i32_1 = arith.constant 0 : i32
    return %arg0, %c0_i32, %c0_i32_0 : i32, i32, i32
  }
  func.func @transform_1(%arg0: i32) -> (i32, i32) {
    %c0_i32 = arith.constant 0 : i32
    %c0_i32_0 = arith.constant 0 : i32
    %c0_i32_1 = arith.constant 0 : i32
    return %c0_i32, %c0_i32_0 : i32, i32
  }
  func.func @transform_2(%arg0: i32) -> (i32, i32) {
    %c0_i32 = arith.constant 0 : i32
    %c0_i32_0 = arith.constant 0 : i32
    %c0_i32_1 = arith.constant 0 : i32
    return %c0_i32, %c0_i32_0 : i32, i32
  }
  func.func @transform_3(%arg0: i32) -> (i32, i32) {
    %c0_i32 = arith.constant 0 : i32
    %c0_i32_0 = arith.constant 0 : i32
    %c0_i32_1 = arith.constant 0 : i32
    return %c0_i32, %c0_i32_0 : i32, i32
  }
  func.func @transform_4(%arg0: i32) -> (i32, i32) {
    %c0_i32 = arith.constant 0 : i32
    %c0_i32_0 = arith.constant 0 : i32
    %c0_i32_1 = arith.constant 0 : i32
    return %c0_i32, %c0_i32_0 : i32, i32
  }
  func.func @transform_5(%arg0: i32) -> (i32, i32) {
    %c0_i32 = arith.constant 0 : i32
    %c0_i32_0 = arith.constant 0 : i32
    %c0_i32_1 = arith.constant 0 : i32
    return %c0_i32, %c0_i32_0 : i32, i32
  }
  func.func @transform_6(%arg0: i32) -> (i32, i32) {
    %c0_i32 = arith.constant 0 : i32
    %c0_i32_0 = arith.constant 0 : i32
    %c0_i32_1 = arith.constant 0 : i32
    return %c0_i32, %c0_i32_0 : i32, i32
  }
  func.func @transform_7(%arg0: i32) -> (i32, i32) {
    %c0_i32 = arith.constant 0 : i32
    %c0_i32_0 = arith.constant 0 : i32
    %c0_i32_1 = arith.constant 0 : i32
    return %c0_i32, %c0_i32_0 : i32, i32
  }
  func.func @transform_8(%arg0: i32) -> (i32, i32, i32) {
    %c0_i32 = arith.constant 0 : i32
    %c0_i32_0 = arith.constant 0 : i32
    %c0_i32_1 = arith.constant 0 : i32
    return %arg0, %c0_i32, %c0_i32_0 : i32, i32, i32
  }
}

</mosaic_0001>

<bundles_post_ra>
// kernel: tpu_custom_call.1
= control target key start
LH: loop header
LB: loop body
LE: loop exit
PB: predicated region body
PF: predicated region fallthrough
CT: control target
= control target key end

     0   :  { %13 = vsyncpa [#allocation4], 0  ;;  %s1773_s0 = inlined_call_operand.hbm [shape: f32[2,4,342], index: 0, kind: input, shape index: {}]   ;;  %s1774_s1 = inlined_call_operand.vmem [shape: bf16[4,36], index: 1, kind: input, shape index: {}]   ;;  %s1775_s2 = inlined_call_operand.vmem [shape: f32[4,1], index: 2, kind: input, shape index: {}]   ;;  %s1776_s3 = inlined_call_operand.vmem [shape: f32[4,1], index: 3, kind: input, shape index: {}]   ;;  %s1777_s4 = inlined_call_operand.vmem [shape: bf16[4,36], index: 4, kind: input, shape index: {}]   ;;  %s1778_s5 = inlined_call_operand.vmem [shape: f32[4,1], index: 5, kind: input, shape index: {}]   ;;  %s1779_s6 = inlined_call_operand.vmem [shape: f32[4,1], index: 6, kind: input, shape index: {}]   ;;  %s1780_s7 = inlined_call_operand.vmem [shape: f32[1,288], index: 7, kind: input, shape index: {}]   ;;  %s1781_s8 = inlined_call_operand.hbm [shape: f32[2,4,256], index: 8, kind: output, shape index: {}]  }
   0x1   :  { %15 = vsyncpa [#allocation4 + $0x1], 0 }
   0x2   :  { %16 = vsyncpa [#allocation5], 0 }
   0x3   :  { %18 = vsyncpa [#allocation5 + $0x1], 0  ;;  %s1398_s27 = smov 0   ;;  %s1400_s28 = smov 0  }
   0x4   :  { %s1402_s29 = smov 0   ;;  %s1404_s30 = smov 0  }
   0x5 LB: > { %1787 = sst [smem:[#allocation9_spill]] %s1324_s29  ;;  %s1419_s9 = sadd.s32 4294967295, %s1328_s30   ;;  %s1328_s30 = sphi %s1404_s30, %s1799_s30   ;;  %s1324_s29 = sphi %s1402_s29, %s1801_s29   ;;  %s1320_s28 = sphi %s1400_s28, %s1803_s28   ;;  %s1316_s27 = sphi %s1398_s27, %s1802_s27  }
   0x6   : > { %s1059_s10 = sadd.s32 4294967294, %s1328_s30   ;;  %s1423_s11 = sadd.s32 1, %s1328_s30  }
   0x7   : > { %1788 = sst [smem:[#allocation10_spill]] %s1423_s11  ;;  %s31_s12 = sadd.s32 1, %s1324_s29 }
   0x8   : > { %s28_s13 = ssub.s32 %s1328_s30, %s1423_s11  ;;  %p38_p0 = scmp.ne.s32.totalorder %s1324_s29, %s1320_s28 }
   0x9   : > { %p29_p1 = scmp.eq.s32.totalorder %s28_s13, 0  ;;  %p39_p2 = scmp.eq.s32.totalorder %s1328_s30, 0 }
   0xa   : > { %p44_p3 = scmp.ne.s32.totalorder %s1320_s28, %s1316_s27  ;;  %p45_p4 = scmp.eq.s32.totalorder %s1419_s9, 0 }
   0xb   : > { %s1435_s14 = scalar_select %p29_p1, %s1324_s29, %s31_s12  }
   0xc   : > { %p40_p5 = por %p39_p2, %p38_p0  ;;  %p1437_p6 = por %p45_p4, %p44_p3 }
   0xd   : > { %1789 = sst [smem:[#allocation11_spill]] %s1435_s14  ;;  %p215_p7 = scmp.eq.s32.totalorder %s1419_s9, 1 }
   0xe   : > { %p221_p8 = scmp.eq.s32.totalorder %s1059_s10, 1  ;;  %p1061_p9 = scmp.ge.s32.totalorder %s1328_s30, 2 }
   0xf   : > { %p1092_p10 = scmp.lt.s32.totalorder %s1328_s30, 2  ;;  %p1444_p11 = por %p215_p7, %p38_p0 }
  0x10   : > { %p1448_p12 = por %p221_p8, %p44_p3  ;;  %s262_s18 = sand.u32 1, %s1324_s29  }
  0x11   : > { %s1078_s19 = smul.u32 12, %s1328_s30  ;;  %p1457_p13 = pnand %p1092_p10, %p40_p5 }
  0x12   : > { %s1077_s20 = smul.u32 12, %s262_s18  ;;  %s263_s12 = scalar_lea.sflag [#allocation4], %s262_s18 }
  0x13   : > { %s271_s23 = scalar_lea.hbm %s1773_s0, %s1078_s19  ;;  %p1236_p1 = pneg %p1457_p13 }
  0x14   : > { %s273_s25 = sshll.u32 %s271_s23, 4  ;;  %s266_s26 = scalar_lea.vmem [#allocation3], %s1077_s20  ;;  %s274_s25 = int_to_ptr.hbm [resolvable:$true] %s273_s25 }
  0x15   : > { %s275_s10 = sshll.u32 %s266_s26, 4  ;;  %s1232_s13 = sshra.s32 %s274_s25, 4  ;;  %s276_s10 = int_to_ptr.vmem [resolvable:$true] %s275_s10  ;;  %s1233_s13 = int_to_ptr.hbm [resolvable:$true] %s1232_s13 }
  0x16   : > { %s1234_s14 = scalar_lea.hbm %s1233_s13, 12  ;;  %s1239_s22 = scalar_lea.hbm %s1773_s0, 24 }
  0x17   : > { %p1235_p0 = scmp.ne.s32.totalorder %s1233_s13, %s1234_s14  ;;  %p1240_p4 = scmp.lt.s32.totalorder %s1233_s13, %s1773_s0 }
  0x18   : > { %p1241_p5 = scmp.lt.s32.totalorder %s1239_s22, %s1234_s14 }
  0x19   : > { %p1237_p2 = pnand %p1236_p1, %p1235_p0 }
  0x1a   : > { %p1242_p7 = por %p1241_p5, %p1240_p4 }
  0x1b   : > { %p1238_p3 = pneg %p1237_p2 }
  0x1d   : > { %p1243_p8 = pnand %p1242_p7, %p1238_p3 }
  0x1f   : > { %1246 = shalt.err (!%p1243_p8)
}
  0x20   : > { %1087 = dma.hbm_to_vmem [thread:$0]  (!%p1457_p13), %s274_s25, 192, %s276_s10, %s263_s12  }
  0x21   : > { %p1063_p10 = scmp.ge.s32.totalorder %s1328_s30, 1  ;;  %p280_p0 = scmp.lt.s32.totalorder %s1328_s30, 3 }
  0x23   : > { %p281_p1 = pnand %p1063_p10, %p280_p0 }
  0x24   : > { %s1474_s18 = sand.u32 (!%p281_p1), 1, %s1320_s28  }
  0x25   : > { %284 = sbr.rel (%p281_p1) target bundleno = 1010 (0x3f2), region = 52  ;;  %s287_s11 = scalar_lea.sflag (!%p281_p1), [#allocation4], %s1474_s18 }
  0x26   : > { %s1079_s29 = smul.u32 (!%p281_p1), 12, %s1474_s18 }
  0x28   : > { %s1478_s14 = scalar_lea.vmem (!%p281_p1), [#allocation3], %s1079_s29 }
  0x2a   : > { %1307 = dma.done.wait (%p1437_p6), %s287_s11, 192  }
  0x2b   : > { %1309 = vsyncadd (%p1437_p6), %s287_s11, 4294967104  ;;  %v1485_v0 = vld [vmem:[%s1478_s14] sm:$0xff]  ;;  %v1488_v1 = vld [vmem:[%s1478_s14 + $0x8] sm:$0xf]  ;;  %s1330_s15 = smov 127   ;;  %s1331_s20 = smov 126  }
  0x2c   : > { %329 = vst [vmem:[#allocation1] ss:$2 sm:$0xff] %v1485_v0  ;;  %s1332_s23 = smov 110   ;;  %s1333_s24 = smov 109   ;;  %v562_v46 = vld [vmem:[%s1775_s2] sm:$0xf] }
  0x2d   : > { %331 = vst [vmem:[#allocation1 + $0x10] ss:$2 sm:$0xff] %v1488_v1  ;;  %s1334_s25 = smov 108   ;;  %s1335_s26 = smov 92   ;;  %v571_v47 = vld [vmem:[%s1776_s3] sm:$0xf] }
  0x2e   : > { %s1336_s10 = smov 91   ;;  %s1337_s12 = smov 90   ;;  %v1338_v48 = vmov 0   ;;  %vm443_vm0 = vcmask 752640   ;;  %vm406_vm1 = vcmask 891904   ;;  %vm425_vm2 = vcmask 883712  }
  0x2f   : > { %1189 = vset.pattern.permute.xlu1 %v1338_v48  ;;  %1190 = vset.pattern.permute.xlu2 %v1338_v48  ;;  %vm1786_vm3 = vcmask 1031168   ;;  %vm462_vm4 = vcmask 744448   ;;  %vm480_vm5 = vcmask 736256   ;;  %vm513_vm6 = vcmask 1041408   ;;  %s1339_s21 = smov 19   ;;  %s1064_s22 = sshll.u32 %s1474_s18, 3 }
  0x30   : > { %1231 = vset.pattern.permute.xlu0 %v1338_v48  ;;  %vm351_vm7 = vcmask 1039360   ;;  %vm486_vm8 = vcmask 1043456   ;;  %vm388_vm9 = vcmask 900096   ;;  %vm1785_vm10 = vcmask 293888   ;;  %s1706_s29 = scalar_lea.vmem [#allocation6], %s1064_s22  ;;  %s1341_s11 = smov 112  }
  0x31   : > { %vm594_vm11 = vcmask 150528   ;;  %vm611_vm12 = vcmask 1043608   ;;  %vm612_vm13 = vcmask 1047556   ;;  %vm606_vm14 = vcmask 154624   ;;  %s1342_s13 = smov 104   ;;  %s1343_s19 = smov 122  }
  0x32   : > { %vm613_vm15 = vmor %vm612_vm13, %vm611_vm12  ;;  %vm964_vm12 = vcmask 818176   ;;  %vm929_vm13 = vcmask 932864  }
  0x33   : > { %v1492_v2 = vld.sshfl [vmem:[#allocation1] sm:$0xff pattern:$0x75316420]  ;;  %v1494_v3 = vld.sshfl [vmem:[#allocation1 + $0x8] sm:$0xff pattern:$0x75316420] }
  0x34   : > { %v1496_v4 = vld.sshfl [vmem:[#allocation1 + $0x10] sm:$0xff pattern:$0x75316420]  ;;  %339 = vst [vmem:[#allocation1 + $0x1] ss:$2 sm:$0xff] %v1485_v0 }
  0x35   : > { %341 = vst [vmem:[#allocation1 + $0x11] ss:$2 sm:$0xff] %v1488_v1 }
  0x3b   : > { %v343_v5 = vld.sshfl [vmem:[#allocation1 + $0x8] sm:$0xff pattern:$0x75316420]  ;;  %v342_v6 = vld.sshfl [vmem:[#allocation1] sm:$0xff pattern:$0x75316420] }
  0x3c   : > { %v344_v7 = vld.sshfl [vmem:[#allocation1 + $0x10] sm:$0xff pattern:$0x75316420]  ;;  %357 = vst [vmem:[#allocation1] ss:$2 sm:$0xff] %v1485_v0 }
  0x3d   : > { %v1149_v8 = vpack.i.bf16 %v344_v7, %v343_v5  ;;  %359 = vst [vmem:[#allocation1 + $0x10] ss:$2 sm:$0xff] %v1488_v1 }
  0x3f   : > { %1150 = vrot.lane.b32.xlu1 %v1149_v8, %s1330_s15 }
  0x43   : > { %v360_v9 = vld.sshfl [vmem:[#allocation1] sm:$0xff pattern:$0x75316420]  ;;  %v361_v10 = vld.sshfl [vmem:[#allocation1 + $0x8] sm:$0xff pattern:$0x75316420] }
  0x44   : > { %v362_v11 = vld.sshfl [vmem:[#allocation1 + $0x10] sm:$0xff pattern:$0x75316420]  ;;  %376 = vst [vmem:[#allocation1 + $0x1] ss:$2 sm:$0xff] %v1485_v0 }
  0x45   : > { %378 = vst [vmem:[#allocation1 + $0x11] ss:$2 sm:$0xff] %v1488_v1  ;;  %v1154_v12 = vpack.i.bf16 %v362_v11, %v361_v10 }
  0x47   : > { %1155 = vrot.lane.b32.xlu2 %v1154_v12, %s1331_s20 }
  0x4b   : > { %v379_v13 = vld.sshfl [vmem:[#allocation1] sm:$0xff pattern:$0x75316420]  ;;  %v380_v14 = vld.sshfl [vmem:[#allocation1 + $0x8] sm:$0xff pattern:$0x75316420] }
  0x4c   : > { %v381_v15 = vld.sshfl [vmem:[#allocation1 + $0x10] sm:$0xff pattern:$0x75316420]  ;;  %394 = vst [vmem:[#allocation1] ss:$2 sm:$0xff] %v1485_v0 }
  0x4d   : > { %396 = vst [vmem:[#allocation1 + $0x10] ss:$2 sm:$0xff] %v1488_v1  ;;  %v1159_v16 = vpack.i.bf16 %v381_v15, %v380_v14 }
  0x4f   : > { %1160 = vrot.lane.b32.xlu0 %v1159_v16, %s1332_s23 }
  0x53   : > { %v398_v17 = vld.sshfl [vmem:[#allocation1 + $0x8] sm:$0xff pattern:$0x75316420]  ;;  %v397_v18 = vld.sshfl [vmem:[#allocation1] sm:$0xff pattern:$0x75316420] }
  0x54   : > { %v399_v19 = vld.sshfl [vmem:[#allocation1 + $0x10] sm:$0xff pattern:$0x75316420]  ;;  %413 = vst [vmem:[#allocation1 + $0x1] ss:$2 sm:$0xff] %v1485_v0 }
  0x55   : > { %v1164_v20 = vpack.i.bf16 %v399_v19, %v398_v17  ;;  %415 = vst [vmem:[#allocation1 + $0x11] ss:$2 sm:$0xff] %v1488_v1 }
  0x57   : > { %1165 = vrot.lane.b32.xlu1 %v1164_v20, %s1333_s24  ;;  %400 = vrot.lane.b32.xlu0 %v397_v18, %s1333_s24 }
  0x5b   : > { %v417_v21 = vld.sshfl [vmem:[#allocation1 + $0x8] sm:$0xff pattern:$0x75316420]  ;;  %v416_v22 = vld.sshfl [vmem:[#allocation1] sm:$0xff pattern:$0x75316420] }
  0x5c   : > { %v418_v23 = vld.sshfl [vmem:[#allocation1 + $0x10] sm:$0xff pattern:$0x75316420]  ;;  %431 = vst [vmem:[#allocation1] ss:$2 sm:$0xff] %v1485_v0 }
  0x5d   : > { %v1169_v24 = vpack.i.bf16 %v418_v23, %v417_v21  ;;  %433 = vst [vmem:[#allocation1 + $0x10] ss:$2 sm:$0xff] %v1488_v1 }
  0x5f   : > { %1170 = vrot.lane.b32.xlu1 %v1169_v24, %s1334_s25 }
  0x63   : > { %v435_v25 = vld.sshfl [vmem:[#allocation1 + $0x8] sm:$0xff pattern:$0x75316420]  ;;  %v434_v26 = vld.sshfl [vmem:[#allocation1] sm:$0xff pattern:$0x75316420] }
  0x64   : > { %v436_v27 = vld.sshfl [vmem:[#allocation1 + $0x10] sm:$0xff pattern:$0x75316420]  ;;  %450 = vst [vmem:[#allocation1 + $0x1] ss:$2 sm:$0xff] %v1485_v0 }
  0x65   : > { %v1174_v28 = vpack.i.bf16 %v436_v27, %v435_v25  ;;  %452 = vst [vmem:[#allocation1 + $0x11] ss:$2 sm:$0xff] %v1488_v1 }
  0x67   : > { %419 = vrot.lane.b32.xlu1 %v416_v22, %s1334_s25  ;;  %1175 = vrot.lane.b32.xlu2 %v1174_v28, %s1335_s26 }
  0x6b   : > { %v453_v29 = vld.sshfl [vmem:[#allocation1] sm:$0xff pattern:$0x75316420]  ;;  %v454_v30 = vld.sshfl [vmem:[#allocation1 + $0x8] sm:$0xff pattern:$0x75316420] }
  0x6c   : > { %456 = vrot.lane.b32.xlu0 %v453_v29, %s1336_s10  ;;  %468 = vst [vmem:[#allocation1] ss:$2 sm:$0xff] %v1485_v0  ;;  %v455_v31 = vld.sshfl [vmem:[#allocation1 + $0x10] sm:$0xff pattern:$0x75316420] }
  0x6d   : > { %470 = vst [vmem:[#allocation1 + $0x10] ss:$2 sm:$0xff] %v1488_v1  ;;  %v1179_v33 = vpack.i.bf16 %v455_v31, %v454_v30 }
  0x6f   : > { %345 = vrot.lane.b32.xlu1 %v342_v6, %s1330_s15  ;;  %437 = vrot.lane.b32.xlu2 %v434_v26, %s1335_s26 }
  0x73   : > { %v472_v32 = vld.sshfl [vmem:[#allocation1 + $0x8] sm:$0xff pattern:$0x75316420]  ;;  %v471_v36 = vld.sshfl [vmem:[#allocation1] sm:$0xff pattern:$0x75316420] }
  0x74   : > { %v473_v34 = vld.sshfl [vmem:[#allocation1 + $0x10] sm:$0xff pattern:$0x75316420] }
  0x75   : > { %v1184_v35 = vpack.i.bf16 %v473_v34, %v472_v32 }
  0x77   : > { %1185 = vrot.lane.b32.xlu0 %v1184_v35, %s1337_s12  ;;  %1180 = vrot.lane.b32.xlu2 %v1179_v33, %s1336_s10 }
  0x78   : > { %565 = vperm.xlu1 %1189, %v562_v46  }
  0x7f   : > { %474 = vrot.lane.b32.xlu0 %v471_v36, %s1337_s12  ;;  %363 = vrot.lane.b32.xlu2 %v360_v9, %s1331_s20 }
  0x87   : > { %382 = vrot.lane.b32.xlu0 %v379_v13, %s1332_s23  ;;  %574 = vperm.xlu2 %1190, %v571_v47  }
  0xa1   : > { %v1530_v37 = vpop.permute.xlu2 %1155 }
  0xa2   : > { %v1158_v49 = vunpack.i.h.bf16 %v1530_v37  ;;  %v1157_v50 = vunpack.i.l.bf16 %v1530_v37 }
  0xa4   : > { %v371_v22 = vsel %vm1786_vm3, %v1157_v50, %v1158_v49 }
  0xb1   : > { %v1532_v38 = vpop.permute.xlu1 %1150 }
  0xb2   : > { %v1153_v51 = vunpack.i.h.bf16 %v1532_v38  ;;  %v1152_v52 = vunpack.i.l.bf16 %v1532_v38 }
  0xb4   : > { %v353_v21 = vsel %vm351_vm7, %v1152_v52, %v1153_v51  ;;  %v489_v26 = vsel %vm486_vm8, %v1496_v4, %v1153_v51 }
  0xb5   : > { %v488_v33 = vsel %vm486_vm8, %v1494_v3, %v353_v21 }
  0xc1   : > { %v1534_v39 = vpop.permute.xlu0 %1160  ;;  %v1536_v40 = vpop.permute.xlu2 %1175 }
  0xc2   : > { %v1178_v53 = vunpack.i.h.bf16 %v1536_v40  ;;  %v1177_v58 = vunpack.i.l.bf16 %v1536_v40  ;;  %v1163_v60 = vunpack.i.h.bf16 %v1534_v39  ;;  %v1162_v6 = vunpack.i.l.bf16 %v1534_v39 }
  0xc4   : > { %v445_v9 = vsel %vm443_vm0, %v1177_v58, %v1178_v53  ;;  %v390_v23 = vsel %vm388_vm9, %v1162_v6, %v1163_v60  ;;  %v492_v27 = vsel %vm486_vm8, %v1158_v49, %v1163_v60 }
  0xc5   : > { %v491_v34 = vsel %vm486_vm8, %v371_v22, %v390_v23  ;;  %v501_v40 = vpack.c.bf16 %v492_v27, %v489_v26 }
  0xc9   : > { %v1538_v41 = vpop.permute.xlu1 %1165  ;;  %v1540_v42 = vpop.permute.xlu0 %400 }
  0xca   : > { %v1542_v43 = vpop.permute.xlu2 %437  ;;  %v1168_v54 = vunpack.i.h.bf16 %v1538_v41  ;;  %v1167_v59 = vunpack.i.l.bf16 %v1538_v41 }
  0xcb   : > { %v444_v28 = vsel %vm443_vm0, %v1542_v43, %v1177_v58  ;;  %v500_v43 = vpack.c.bf16 %v491_v34, %v488_v33 }
  0xcc   : > { %v408_v8 = vsel %vm406_vm1, %v1167_v59, %v1168_v54  ;;  %v407_v4 = vsel %vm406_vm1, %v1540_v42, %v1167_v59 }
  0xd1   : > { %v1544_v44 = vpop.permute.xlu1 %1170 }
  0xd2   : > { %v1181_v55 = vpop.permute.xlu2 %1180  ;;  %v1173_v56 = vunpack.i.h.bf16 %v1544_v44  ;;  %v1172_v62 = vunpack.i.l.bf16 %v1544_v44 }
  0xd3   : > { %v1183_v57 = vunpack.i.h.bf16 %v1181_v55  ;;  %v1182_v63 = vunpack.i.l.bf16 %v1181_v55 }
  0xd4   : > { %v427_v12 = vsel %vm425_vm2, %v1172_v62, %v1173_v56  ;;  %v495_v16 = vsel %vm486_vm8, %v1168_v54, %v1173_v56 }
  0xd5   : > { %v464_v13 = vsel %vm462_vm4, %v1182_v63, %v1183_v57  ;;  %v498_v17 = vsel %vm486_vm8, %v1178_v53, %v1183_v57  ;;  %v494_v19 = vsel %vm486_vm8, %v408_v8, %v427_v12 }
  0xd6   : > { %v497_v20 = vsel %vm486_vm8, %v445_v9, %v464_v13  ;;  %v504_v25 = vpack.c.bf16 %v498_v17, %v495_v16  ;;  %v1340_v16 = vmov 0.0  }
  0xd7   : > { %v503_v31 = vpack.c.bf16 %v497_v20, %v494_v19  ;;  %595 = vst.msk [vmem:[#allocation2] sm:$0xf] %vm594_vm11, %v1340_v16  ;;  %vm921_vm11 = vcmask 913152  }
  0xd9   : > { %v420_v7 = vpop.permute.xlu1 %419 }
  0xda   : > { %v426_v35 = vsel %vm425_vm2, %v420_v7, %v1172_v62  ;;  %v364_v44 = vpop.permute.xlu2 %363 }
  0xdb   : > { %v493_v3 = vsel %vm486_vm8, %v407_v4, %v426_v35  ;;  %v370_v48 = vsel %vm1786_vm3, %v364_v44, %v1157_v50  ;;  %v583_v50 = vld [vmem:[%s1780_s7] sm:$0x7]  ;;  %vm617_vm3 = vcmask 699800  }
  0xdc   : > { %v586_v56 = vperm.slane %v583_v50, 1  ;;  %v585_v7 = vperm.slane %v583_v50, 0 }
  0xde   : > { %v457_v45 = vpop.permute.xlu0 %456 }
  0xdf   : > { %v463_v29 = vsel %vm462_vm4, %v457_v45, %v1182_v63  ;;  %v508_v45 = vld [vmem:[%s1774_s1] sm:$0x3] }
  0xe0   : > { %v496_v41 = vsel %vm486_vm8, %v444_v28, %v463_v29 }
  0xe1   : > { %v346_v36 = vpop.permute.xlu1 %345  ;;  %v502_v46 = vpack.c.bf16 %v496_v41, %v493_v3 }
  0xe2   : > { %v352_v42 = vsel %vm351_vm7, %v346_v36, %v1152_v52  ;;  %v575_v54 = vpop.permute.xlu2 %574 }
  0xe3   : > { %v487_v51 = vsel %vm486_vm8, %v1492_v2, %v352_v42 }
  0xe9   : > { %v1186_v61 = vpop.permute.xlu0 %1185 }
  0xea   : > { %v1188_v1 = vunpack.i.h.bf16 %v1186_v61  ;;  %v1187_v5 = vunpack.i.l.bf16 %v1186_v61  ;;  %v566_v53 = vpop.permute.xlu1 %565 }
  0xec   : > { %v507_v10 = vpack.c.bf16 %v1188_v1, %v1188_v1  ;;  %v482_v11 = vsel %vm480_vm5, %v1187_v5, %v1188_v1 }
  0xed   : > { %v506_v14 = vpack.c.bf16 %v482_v11, %v482_v11 }
  0xee   : > { %v521_v15 = vsel %vm513_vm6, %v507_v10, 0 }
  0xef   : > { %554 = vmatpush.bf16.msra.mxu2 %v521_v15  ;;  %v518_v18 = vsel %vm513_vm6, %v506_v14, 0 }
  0xf0   : > { %541 = vmatpush.bf16.msra.mxu1 %v518_v18 }
  0xf1   : > { %v475_v24 = vpop.permute.xlu0 %474 }
  0xf2   : > { %v481_v30 = vsel %vm480_vm5, %v475_v24, %v1187_v5  ;;  %v587_v5 = vperm.slane %v583_v50, 2  ;;  %v864_v50 = vld [vmem:[%s1478_s14 + $0x8] sm:$0xf]  ;;  %s1345_s14 = smov 120  }
  0xf3   : > { %555 = vmatpush.bf16.msra.mxu2 %v504_v25  ;;  %v505_v32 = vpack.c.bf16 %v481_v30, %v481_v30 }
  0xf4   : > { %542 = vmatpush.bf16.msra.mxu1 %v503_v31 }
  0xf5   : > { %v515_v39 = vsel %vm513_vm6, %v505_v32, 0 }
  0xf6   : > { %528 = vmatpush.bf16.msra.mxu0 %v515_v39 }
  0xf7   : > { %556 = vmatpush.bf16.msra.mxu2 %v501_v40 }
  0xf8   : > { %543 = vmatpush.bf16.msra.mxu1 %v500_v43 }
  0xf9   : > { %v383_v47 = vpop.permute.xlu0 %382 }
  0xfa   : > { %v389_v49 = vsel %vm388_vm9, %v383_v47, %v1162_v6  ;;  %529 = vmatpush.bf16.msra.mxu0 %v502_v46  ;;  %1067 = vmatmul.msk.bf16.vlgmr.msra.gmra.mxu2 %vm1785_vm10, %v508_v45 }
  0xfb   : > { %1066 = vmatmul.msk.bf16.vlgmr.msra.gmra.mxu1 %vm1785_vm10, %v508_v45  ;;  %v490_v38 = vsel %vm486_vm8, %v370_v48, %v389_v49 }
  0xfc   : > { %v499_v52 = vpack.c.bf16 %v490_v38, %v487_v51 }
  0xfe   : > { %530 = vmatpush.bf16.msra.mxu0 %v499_v52 }
 0x101   : > { %1065 = vmatmul.msk.bf16.vlgmr.msra.gmra.mxu0 %vm1785_vm10, %v508_v45  ;;  %vm615_vm10 = vcmask 412672  }
 0x178   : > { %v545_v37 = vpop.f32.mrf.mxu1 }
 0x179   : > { %v569_v55 = vmul.f32 %v566_v53, %v545_v37 }
 0x17b   : > { %v578_v57 = vadd.f32 %v575_v54, %v569_v55 }
 0x17d   : > { %v558_v58 = vpop.f32.mrf.mxu2  ;;  %v581_v59 = vmax.f32 %v578_v57, 0.0 }
 0x17e   : > { %v570_v60 = vmul.f32 %v566_v53, %v558_v58  ;;  %v532_v2 = vpop.f32.mrf.mxu0  ;;  %v854_v58 = vld [vmem:[%s1779_s6] sm:$0xf] }
 0x17f   : > { %v592_v61 = vmul.f32 %v586_v56, %v581_v59  ;;  %v568_v62 = vmul.f32 %v566_v53, %v532_v2 }
 0x180   : > { %v579_v63 = vadd.f32 %v575_v54, %v570_v60  ;;  %v547_v1 = vpop.f32.mrf.mxu1 }
 0x181   : > { %v577_v6 = vadd.f32 %v575_v54, %v568_v62  ;;  %v599_v10 = vrot.slane %v592_v61, 4 }
 0x182   : > { %v582_v8 = vmax.f32 %v579_v63, 0.0 }
 0x183   : > { %v580_v9 = vmax.f32 %v577_v6, 0.0 }
 0x184   : > { %v593_v11 = vmul.f32 %v587_v5, %v582_v8 }
 0x185   : > { %v591_v12 = vmul.f32 %v585_v7, %v580_v9  ;;  %v560_v13 = vpop.f32.mrf.mxu2 }
 0x186   : > { %603 = vrot.lane.b32.xlu1 %v593_v11, %s1339_s21  ;;  %v534_v14 = vpop.f32.mrf.mxu0 }
 0x187   : > { %v600_v15 = vsel %vm486_vm8, %v591_v12, %v599_v10 }
 0x188   : > { %601 = vrot.lane.b32.xlu0 %v600_v15, %s1339_s21  ;;  %s1344_s21 = smov 106  }
 0x1f8   : > { %v604_v19 = vpop.permute.xlu1 %603 }
 0x1fa   : > { %v602_v17 = vpop.permute.xlu0 %601 }
 0x1fb   : > { %v605_v18 = vrot.slane %v602_v17, 4 }
 0x1fd   : > { %v607_v20 = vsel %vm606_vm14, %v605_v18, %v602_v17  ;;  %v608_v21 = vsel %vm606_vm14, %v605_v18, %v604_v19  ;;  %vm932_vm14 = vcmask 1044352  }
 0x1fe   : > { %614 = vst.msk [vmem:[#allocation2] sm:$0xff] %vm613_vm15, %v607_v20 }
 0x1ff   : > { %616 = vst.msk [vmem:[#allocation2 + $0x8] sm:$0xf] %vm615_vm10, %v608_v21  ;;  %v845_v21 = vld [vmem:[%s1778_s5] sm:$0xf]  ;;  %vm916_vm10 = vcmask 781952  }
 0x200   : > { %618 = vst.msk [vmem:[#allocation2 + $0x8] sm:$0xf] %vm617_vm3, %v1340_v16  ;;  %vm1794_vm3 = vcmask 1031168  }
 0x205   : > { %v619_v22 = vld [vmem:[#allocation2] sm:$0xff] }
 0x206   : > { %623 = vst [vmem:[#allocation1] ss:$2 sm:$0xff] %v619_v22 }
 0x207   : > { %v620_v23 = vld [vmem:[#allocation2 + $0x8] sm:$0xf] }
 0x208   : > { %625 = vst [vmem:[#allocation1 + $0x10] ss:$2 sm:$0xff] %v620_v23 }
 0x20d   : > { %v1618_v24 = vld.sshfl [vmem:[#allocation1] sm:$0xff pattern:$0x75316420]  ;;  %v1620_v25 = vld.sshfl [vmem:[#allocation1 + $0x8] sm:$0xff pattern:$0x75316420] }
 0x20e   : > { %633 = vst [vmem:[#allocation1 + $0x1] ss:$2 sm:$0xff] %v619_v22 }
 0x20f   : > { %v1622_v26 = vld.sshfl [vmem:[#allocation1 + $0x10] sm:$0xff pattern:$0x75316420] }
 0x210   : > { %635 = vst [vmem:[#allocation1 + $0x11] ss:$2 sm:$0xff] %v620_v23 }
 0x215   : > { %v636_v27 = vld.sshfl [vmem:[#allocation1] sm:$0xff pattern:$0x75316420]  ;;  %v637_v28 = vld.sshfl [vmem:[#allocation1 + $0x8] sm:$0xff pattern:$0x75316420] }
 0x216   : > { %v1191_v29 = vpack.i.bf16 %v637_v28, %v636_v27  ;;  %650 = vst [vmem:[#allocation1] ss:$2 sm:$0xff] %v619_v22 }
 0x217   : > { %v638_v30 = vld.sshfl [vmem:[#allocation1 + $0x10] sm:$0xff pattern:$0x75316420] }
 0x218   : > { %652 = vst [vmem:[#allocation1 + $0x10] ss:$2 sm:$0xff] %v620_v23  ;;  %1192 = vrot.lane.b32.xlu2 %v1191_v29, %s1330_s15 }
 0x21d   : > { %v653_v31 = vld.sshfl [vmem:[#allocation1] sm:$0xff pattern:$0x75316420]  ;;  %v654_v32 = vld.sshfl [vmem:[#allocation1 + $0x8] sm:$0xff pattern:$0x75316420] }
 0x21e   : > { %v1196_v33 = vpack.i.bf16 %v654_v32, %v653_v31  ;;  %668 = vst [vmem:[#allocation1 + $0x1] ss:$2 sm:$0xff] %v619_v22 }
 0x21f   : > { %v655_v34 = vld.sshfl [vmem:[#allocation1 + $0x10] sm:$0xff pattern:$0x75316420] }
 0x220   : > { %1197 = vrot.lane.b32.xlu0 %v1196_v33, %s1331_s20  ;;  %670 = vst [vmem:[#allocation1 + $0x11] ss:$2 sm:$0xff] %v620_v23 }
 0x225   : > { %v671_v4 = vld.sshfl [vmem:[#allocation1] sm:$0xff pattern:$0x75316420]  ;;  %v672_v35 = vld.sshfl [vmem:[#allocation1 + $0x8] sm:$0xff pattern:$0x75316420] }
 0x226   : > { %v1201_v36 = vpack.i.bf16 %v672_v35, %v671_v4  ;;  %685 = vst [vmem:[#allocation1] ss:$2 sm:$0xff] %v619_v22 }
 0x227   : > { %v673_v39 = vld.sshfl [vmem:[#allocation1 + $0x10] sm:$0xff pattern:$0x75316420] }
 0x228   : > { %1202 = vrot.lane.b32.xlu1 %v1201_v36, %s1332_s23  ;;  %687 = vst [vmem:[#allocation1 + $0x10] ss:$2 sm:$0xff] %v620_v23 }
 0x22d   : > { %v688_v40 = vld.sshfl [vmem:[#allocation1] sm:$0xff pattern:$0x75316420]  ;;  %v689_v41 = vld.sshfl [vmem:[#allocation1 + $0x8] sm:$0xff pattern:$0x75316420] }
 0x22e   : > { %v1206_v43 = vpack.i.bf16 %v689_v41, %v688_v40  ;;  %703 = vst [vmem:[#allocation1 + $0x1] ss:$2 sm:$0xff] %v619_v22 }
 0x22f   : > { %v690_v44 = vld.sshfl [vmem:[#allocation1 + $0x10] sm:$0xff pattern:$0x75316420] }
 0x230   : > { %1207 = vrot.lane.b32.xlu0 %v1206_v43, %s1333_s24  ;;  %695 = vrot.lane.b32.xlu2 %v690_v44, %s1333_s24  ;;  %705 = vst [vmem:[#allocation1 + $0x11] ss:$2 sm:$0xff] %v620_v23 }
 0x235   : > { %v706_v3 = vld.sshfl [vmem:[#allocation1] sm:$0xff pattern:$0x75316420]  ;;  %v707_v45 = vld.sshfl [vmem:[#allocation1 + $0x8] sm:$0xff pattern:$0x75316420] }
 0x236   : > { %v1211_v42 = vpack.i.bf16 %v707_v45, %v706_v3  ;;  %720 = vst [vmem:[#allocation1] ss:$2 sm:$0xff] %v619_v22 }
 0x237   : > { %v708_v46 = vld.sshfl [vmem:[#allocation1 + $0x10] sm:$0xff pattern:$0x75316420] }
 0x238   : > { %1212 = vrot.lane.b32.xlu1 %v1211_v42, %s1334_s25  ;;  %722 = vst [vmem:[#allocation1 + $0x10] ss:$2 sm:$0xff] %v620_v23 }
 0x23d   : > { %v723_v47 = vld.sshfl [vmem:[#allocation1] sm:$0xff pattern:$0x75316420]  ;;  %v724_v48 = vld.sshfl [vmem:[#allocation1 + $0x8] sm:$0xff pattern:$0x75316420] }
 0x23e   : > { %v1216_v49 = vpack.i.bf16 %v724_v48, %v723_v47  ;;  %738 = vst [vmem:[#allocation1 + $0x1] ss:$2 sm:$0xff] %v619_v22 }
 0x23f   : > { %v725_v51 = vld.sshfl [vmem:[#allocation1 + $0x10] sm:$0xff pattern:$0x75316420] }
 0x240   : > { %730 = vrot.lane.b32.xlu1 %v725_v51, %s1335_s26  ;;  %740 = vst [vmem:[#allocation1 + $0x11] ss:$2 sm:$0xff] %v620_v23  ;;  %1217 = vrot.lane.b32.xlu2 %v1216_v49, %s1335_s26  ;;  %s1346_s26 = smov 100  }
 0x245   : > { %v741_v38 = vld.sshfl [vmem:[#allocation1] sm:$0xff pattern:$0x75316420]  ;;  %v742_v52 = vld.sshfl [vmem:[#allocation1 + $0x8] sm:$0xff pattern:$0x75316420] }
 0x246   : > { %v1221_v53 = vpack.i.bf16 %v742_v52, %v741_v38  ;;  %755 = vst [vmem:[#allocation1] ss:$2 sm:$0xff] %v619_v22 }
 0x247   : > { %v743_v37 = vld.sshfl [vmem:[#allocation1 + $0x10] sm:$0xff pattern:$0x75316420] }
 0x248   : > { %1222 = vrot.lane.b32.xlu0 %v1221_v53, %s1336_s10  ;;  %757 = vst [vmem:[#allocation1 + $0x10] ss:$2 sm:$0xff] %v620_v23 }
 0x24d   : > { %v758_v54 = vld.sshfl [vmem:[#allocation1] sm:$0xff pattern:$0x75316420]  ;;  %v759_v55 = vld.sshfl [vmem:[#allocation1 + $0x8] sm:$0xff pattern:$0x75316420] }
 0x24e   : > { %v1226_v56 = vpack.i.bf16 %v759_v55, %v758_v54  ;;  %867 = vst [vmem:[#allocation1] ss:$2 sm:$0xff] %v1485_v0 }
 0x24f   : > { %v760_v57 = vld.sshfl [vmem:[#allocation1 + $0x10] sm:$0xff pattern:$0x75316420] }
 0x250   : > { %765 = vrot.lane.b32.xlu1 %v760_v57, %s1337_s12  ;;  %713 = vrot.lane.b32.xlu0 %v708_v46, %s1334_s25  ;;  %869 = vst [vmem:[#allocation1 + $0x10] ss:$2 sm:$0xff] %v864_v50  ;;  %v793_v50 = vld [vmem:[%s1777_s4] sm:$0x3] }
 0x251   : > { %1227 = vrot.lane.b32.xlu2 %v1226_v56, %s1337_s12  ;;  %s1352_s12 = smov 102  }
 0x255   : > { %v871_v59 = vld.sshfl [vmem:[#allocation1 + $0x8] sm:$0xff pattern:$0x75316420]  ;;  %v870_v60 = vld.sshfl [vmem:[#allocation1] sm:$0xff pattern:$0x75316420] }
 0x257   : > { %v872_v0 = vld.sshfl [vmem:[#allocation1 + $0x10] sm:$0xff pattern:$0x75316420] }
 0x258   : > { %660 = vrot.lane.b32.xlu1 %v655_v34, %s1331_s20  ;;  %643 = vrot.lane.b32.xlu0 %v638_v30, %s1330_s15  ;;  %s1349_s15 = smov 114  }
 0x259   : > { %748 = vrot.lane.b32.xlu2 %v743_v37, %s1336_s10  ;;  %s1351_s10 = smov 116  }
 0x260   : > { %857 = vperm.xlu1 %1189, %v854_v58   ;;  %848 = vperm.xlu0 %1231, %v845_v21  }
 0x261   : > { %678 = vrot.lane.b32.xlu2 %v673_v39, %s1332_s23 }
 0x268   : > { %877 = vrot.lane.b32.xlu1 %v872_v0, %s1333_s24 }
 0x269   : > { %875 = vrot.lane.b32.xlu2 %v871_v59, %s1333_s24 }
 0x271   : > { %873 = vrot.lane.b32.xlu2 %v870_v60, %s1333_s24  ;;  %s1350_s24 = smov 98  }
 0x272   : > { %v1648_v2 = vpop.permute.xlu2 %1192 }
 0x273   : > { %v1195_v22 = vunpack.i.h.bf16 %v1648_v2  ;;  %v1194_v23 = vunpack.i.l.bf16 %v1648_v2 }
 0x275   : > { %v645_v44 = vsel %vm351_vm7, %v1194_v23, %v1195_v22 }
 0x276   : > { %v772_v47 = vsel %vm486_vm8, %v1618_v24, %v645_v44 }
 0x28a   : > { %v696_v61 = vpop.permute.xlu2 %695 }
 0x292   : > { %v1652_v1 = vpop.permute.xlu0 %1197 }
 0x293   : > { %v1200_v27 = vunpack.i.h.bf16 %v1652_v1  ;;  %v1199_v30 = vunpack.i.l.bf16 %v1652_v1 }
 0x295   : > { %v662_v3 = vsel %vm1794_vm3, %v1199_v30, %v1200_v27 }
 0x29a   : > { %v1218_v62 = vpop.permute.xlu2 %1217  ;;  %v1650_v63 = vpop.permute.xlu1 %1202 }
 0x29b   : > { %v1205_v15 = vunpack.i.h.bf16 %v1650_v63  ;;  %v1204_v16 = vunpack.i.l.bf16 %v1650_v63  ;;  %v1220_v17 = vunpack.i.h.bf16 %v1218_v62  ;;  %v1219_v18 = vunpack.i.l.bf16 %v1218_v62 }
 0x29d   : > { %v732_v35 = vsel %vm443_vm0, %v1219_v18, %v1220_v17  ;;  %v680_v39 = vsel %vm388_vm9, %v1204_v16, %v1205_v15 }
 0x29e   : > { %v775_v45 = vsel %vm486_vm8, %v662_v3, %v680_v39 }
 0x29f   : > { %v784_v38 = vpack.c.bf16 %v775_v45, %v772_v47 }
 0x2a2   : > { %v1208_v12 = vpop.permute.xlu0 %1207 }
 0x2a3   : > { %v1210_v19 = vunpack.i.h.bf16 %v1208_v12  ;;  %v1209_v20 = vunpack.i.l.bf16 %v1208_v12 }
 0x2a5   : > { %v697_v4 = vsel %vm406_vm1, %v1209_v20, %v1210_v19  ;;  %v698_v54 = vsel %vm406_vm1, %v1210_v19, %v696_v61 }
 0x2aa   : > { %v1213_v10 = vpop.permute.xlu1 %1212 }
 0x2ab   : > { %v1228_v5 = vpop.permute.xlu2 %1227  ;;  %v1215_v13 = vunpack.i.h.bf16 %v1213_v10  ;;  %v1214_v14 = vunpack.i.l.bf16 %v1213_v10 }
 0x2ac   : > { %v1230_v6 = vunpack.i.h.bf16 %v1228_v5  ;;  %v1229_v7 = vunpack.i.l.bf16 %v1228_v5 }
 0x2ad   : > { %v715_v33 = vsel %vm425_vm2, %v1214_v14, %v1215_v13 }
 0x2ae   : > { %v767_v8 = vsel %vm480_vm5, %v1229_v7, %v1230_v6  ;;  %v778_v40 = vsel %vm486_vm8, %v697_v4, %v715_v33 }
 0x2af   : > { %v790_v9 = vpack.c.bf16 %v767_v8, %v767_v8 }
 0x2b1   : > { %v798_v11 = vsel %vm513_vm6, %v790_v9, 0 }
 0x2b2   : > { %811 = vmatpush.bf16.msra.mxu3 %v798_v11  ;;  %v731_v28 = vpop.permute.xlu1 %730 }
 0x2b3   : > { %v749_v34 = vpop.permute.xlu2 %748  ;;  %v733_v57 = vsel %vm443_vm0, %v1220_v17, %v731_v28 }
 0x2b4   : > { %v783_v58 = vsel %vm486_vm8, %v731_v28, %v749_v34 }
 0x2ba   : > { %v1223_v29 = vpop.permute.xlu0 %1222 }
 0x2bb   : > { %v1225_v31 = vunpack.i.h.bf16 %v1223_v29  ;;  %v1224_v32 = vunpack.i.l.bf16 %v1223_v29  ;;  %v679_v0 = vpop.permute.xlu2 %678 }
 0x2bd   : > { %v750_v36 = vsel %vm462_vm4, %v1224_v32, %v1225_v31  ;;  %v751_v24 = vsel %vm462_vm4, %v1225_v31, %v749_v34  ;;  %vm1796_vm4 = vmmov %vm1794_vm3 }
 0x2be   : > { %v781_v41 = vsel %vm486_vm8, %v732_v35, %v750_v36  ;;  %v782_v60 = vsel %vm486_vm8, %v733_v57, %v751_v24 }
 0x2bf   : > { %v787_v43 = vpack.c.bf16 %v781_v41, %v778_v40 }
 0x2c1   : > { %812 = vmatpush.bf16.msra.mxu3 %v787_v43 }
 0x2c2   : > { %v766_v42 = vpop.permute.xlu1 %765  ;;  %v714_v46 = vpop.permute.xlu0 %713 }
 0x2c3   : > { %v768_v48 = vsel %vm480_vm5, %v1230_v6, %v766_v42  ;;  %v792_v49 = vpack.c.bf16 %v766_v42, %v766_v42  ;;  %v716_v51 = vsel %vm425_vm2, %v1215_v13, %v714_v46  ;;  %v780_v53 = vsel %vm486_vm8, %v696_v61, %v714_v46  ;;  %v876_v12 = vpop.permute.xlu2 %875 }
 0x2c4   : > { %v791_v52 = vpack.c.bf16 %v768_v48, %v768_v48  ;;  %v779_v56 = vsel %vm486_vm8, %v698_v54, %v716_v51  ;;  %vm1795_vm2 = vcmask 293888   ;;  %v789_v59 = vpack.c.bf16 %v783_v58, %v780_v53 }
 0x2c5   : > { %813 = vmatpush.bf16.msra.mxu3 %v784_v38  ;;  %v804_v37 = vsel %vm513_vm6, %v792_v49, 0  ;;  %v788_v2 = vpack.c.bf16 %v782_v60, %v779_v56  ;;  %v681_v61 = vsel %vm388_vm9, %v1205_v15, %v679_v0  ;;  %vm1797_vm0 = vmmov %vm1795_vm2  ;;  %vm911_vm9 = vcmask 650752  }
 0x2c6   : > { %837 = vmatpush.bf16.msrb.mxu1 %v804_v37  ;;  %v801_v55 = vsel %vm513_vm6, %v791_v52, 0  ;;  %vm1798_vm5 = vmmov %vm1797_vm0  ;;  %vm890_vm6 = vcmask 125952  }
 0x2c7   : > { %824 = vmatpush.bf16.msrb.mxu0 %v801_v55 }
 0x2c8   : > { %1068 = vmatmul.msk.bf16.vlgmr.msra.gmra.mxu3 %vm1795_vm2, %v793_v50 }
 0x2ca   : > { %v661_v62 = vpop.permute.xlu1 %660  ;;  %838 = vmatpush.bf16.msrb.mxu1 %v789_v59  ;;  %v644_v63 = vpop.permute.xlu0 %643 }
 0x2cb   : > { %v663_v1 = vsel %vm1796_vm4, %v1200_v27, %v661_v62  ;;  %v777_v5 = vsel %vm486_vm8, %v661_v62, %v679_v0  ;;  %v646_v6 = vsel %vm351_vm7, %v1195_v22, %v644_v63  ;;  %v774_v7 = vsel %vm486_vm8, %v1622_v26, %v644_v63  ;;  %825 = vmatpush.bf16.msrb.mxu0 %v788_v2  ;;  %v874_v26 = vpop.permute.xlu2 %873 }
 0x2cc   : > { %v786_v8 = vpack.c.bf16 %v777_v5, %v774_v7  ;;  %v773_v9 = vsel %vm486_vm8, %v1620_v25, %v646_v6  ;;  %v776_v10 = vsel %vm486_vm8, %v663_v1, %v681_v61  ;;  %v879_v25 = vsel %vm406_vm1, %v874_v26, %v876_v12 }
 0x2cd   : > { %v785_v11 = vpack.c.bf16 %v776_v10, %v773_v9  ;;  %vm901_vm7 = vcmask 388352  }
 0x2ce   : > { %839 = vmatpush.bf16.msrb.mxu1 %v786_v8 }
 0x2cf   : > { %826 = vmatpush.bf16.msrb.mxu0 %v785_v11 }
 0x2d1   : > { %1070 = vmatmul.msk.bf16.vlgmr.msrb.gmra.mxu1 %vm1797_vm0, %v793_v50 }
 0x2d2   : > { %1069 = vmatmul.msk.bf16.vlgmr.msrb.gmra.mxu0 %vm1798_vm5, %v793_v50  ;;  %v858_v13 = vpop.permute.xlu1 %857  ;;  %v849_v14 = vpop.permute.xlu0 %848 }
 0x2da   : > { %v878_v20 = vpop.permute.xlu1 %877 }
 0x2db   : > { %v880_v28 = vsel %vm406_vm1, %v876_v12, %v878_v20  ;;  %vm896_vm1 = vcmask 257152  }
 0x34b   : > { %v815_v15 = vpop.f32.mrf.mxu3 }
 0x34c   : > { %v851_v16 = vmul.f32 %v849_v14, %v815_v15 }
 0x34e   : > { %v860_v17 = vadd.f32 %v858_v13, %v851_v16  ;;  %v841_v18 = vpop.f32.mrf.mxu1 }
 0x34f   : > { %v828_v19 = vpop.f32.mrf.mxu0  ;;  %v853_v29 = vmul.f32 %v849_v14, %v841_v18 }
 0x350   : > { %v884_v21 = vadd.f32 %v879_v25, %v860_v17  ;;  %v852_v22 = vmul.f32 %v849_v14, %v828_v19 }
 0x351   : > { %v862_v34 = vadd.f32 %v858_v13, %v853_v29 }
 0x352   : > { %v887_v23 = vmax.f32 %v884_v21, 0.0  ;;  %v861_v27 = vadd.f32 %v858_v13, %v852_v22 }
 0x353   : > { %v817_v30 = vpop.f32.mrf.mxu3  ;;  %v886_v35 = vadd.f32 %v878_v20, %v862_v34 }
 0x354   : > { %v885_v31 = vadd.f32 %v880_v28, %v861_v27  ;;  %891 = vst.msk [vmem:[%s1706_s29] sm:$0xf] %vm890_vm6, %v887_v23 }
 0x355   : > { %v889_v36 = vmax.f32 %v886_v35, 0.0 }
 0x356   : > { %v888_v32 = vmax.f32 %v885_v31, 0.0  ;;  %v843_v33 = vpop.f32.mrf.mxu1 }
 0x357   : > { %v830_v4 = vpop.f32.mrf.mxu0  ;;  %v959_v39 = vrot.slane %v889_v36, 4 }
 0x358   : > { %942 = vrot.lane.b32.xlu1 %v888_v32, %s1334_s25  ;;  %938 = vrot.lane.b32.xlu2 %v888_v32, %s1332_s23  ;;  %s1347_s25 = smov 124   ;;  %v924_v41 = vrot.slane %v888_v32, 4  ;;  %s1348_s23 = smov 118  }
 0x359   : > { %934 = vrot.lane.b32.xlu0 %v888_v32, %s1341_s11  ;;  %v960_v40 = vsel %vm486_vm8, %v888_v32, %v959_v39 }
 0x35a   : > { %v925_v43 = vsel %vm486_vm8, %v887_v23, %v924_v41  ;;  %vm906_vm8 = vcmask 519552  }
 0x360   : > { %950 = vrot.lane.b32.xlu1 %v888_v32, %s1342_s13  ;;  %903 = vrot.lane.b32.xlu2 %v887_v23, %s1343_s19 }
 0x361   : > { %946 = vrot.lane.b32.xlu0 %v888_v32, %s1344_s21  ;;  %s973_s21 = scalar_lea.sflag [#allocation5], %s1474_s18 }
 0x368   : > { %908 = vrot.lane.b32.xlu2 %v887_v23, %s1345_s14  ;;  %961 = vrot.lane.b32.xlu1 %v960_v40, %s1346_s26 }
 0x369   : > { %898 = vrot.lane.b32.xlu0 %v887_v23, %s1347_s25 }
 0x370   : > { %913 = vrot.lane.b32.xlu2 %v887_v23, %s1348_s23  ;;  %893 = vrot.lane.b32.xlu1 %v887_v23, %s1331_s20  ;;  %s1076_s20 = sshll.u32 %s1419_s9, 3  ;;  %s986_s9 = sshll.u32 %s1706_s29, 4  ;;  %s987_s9 = int_to_ptr.vmem [resolvable:$true] %s986_s9 }
 0x371   : > { %926 = vrot.lane.b32.xlu0 %v925_v43, %s1349_s15  ;;  %s984_s13 = scalar_lea.hbm %s1781_s8, %s1076_s20  ;;  %s1282_s15 = scalar_lea.hbm %s1781_s8, 16 }
 0x372   : > { %s988_s19 = sshll.u32 %s984_s13, 4  ;;  %s989_s19 = int_to_ptr.hbm [resolvable:$true] %s988_s19 }
 0x373   : > { %s1276_s14 = sshra.s32 %s989_s19, 4  ;;  %s1277_s14 = int_to_ptr.hbm [resolvable:$true] %s1276_s14 }
 0x374   : > { %s1278_s26 = scalar_lea.hbm %s1277_s14, 8  ;;  %p1283_p3 = scmp.lt.s32.totalorder %s1277_s14, %s1781_s8 }
 0x375   : > { %p1279_p6 = scmp.ne.s32.totalorder %s1277_s14, %s1278_s26  ;;  %p1284_p4 = scmp.lt.s32.totalorder %s1282_s15, %s1278_s26 }
 0x377   : > { %p1280_p13 = pnand %p1279_p6, %p1444_p11  ;;  %p1285_p5 = por %p1284_p4, %p1283_p3 }
 0x378   : > { %968 = vrot.lane.b32.xlu2 %v889_v36, %s1350_s24  ;;  %918 = vrot.lane.b32.xlu1 %v887_v23, %s1351_s10 }
 0x379   : > { %954 = vrot.lane.b32.xlu0 %v888_v32, %s1352_s12  ;;  %p1281_p2 = pneg %p1280_p13 }
 0x37b   : > { %p1286_p7 = pnand %p1285_p5, %p1281_p2 }
 0x3b2   : > { %v939_v44 = vpop.permute.xlu2 %938 }
 0x3ba   : > { %v904_v42 = vpop.permute.xlu2 %903 }
 0x3c2   : > { %v909_v48 = vpop.permute.xlu2 %908 }
 0x3ca   : > { %v943_v3 = vpop.permute.xlu1 %942  ;;  %v914_v53 = vpop.permute.xlu2 %913 }
 0x3cb   : > { %v935_v45 = vpop.permute.xlu0 %934 }
 0x3cc   : > { %937 = vst.msk [vmem:[%s1706_s29 + $0x4] sm:$0xf] %vm890_vm6, %v935_v45 }
 0x3cd   : > { %941 = vst.msk [vmem:[%s1706_s29 + $0x4] sm:$0xf] %vm896_vm1, %v939_v44 }
 0x3ce   : > { %945 = vst.msk [vmem:[%s1706_s29 + $0x4] sm:$0xf] %vm901_vm7, %v943_v3 }
 0x3d2   : > { %v951_v46 = vpop.permute.xlu1 %950  ;;  %v969_v57 = vpop.permute.xlu2 %968 }
 0x3d3   : > { %v947_v47 = vpop.permute.xlu0 %946 }
 0x3d4   : > { %949 = vst.msk [vmem:[%s1706_s29 + $0x4] sm:$0xf] %vm906_vm8, %v947_v47 }
 0x3d5   : > { %953 = vst.msk [vmem:[%s1706_s29 + $0x4] sm:$0xf] %vm911_vm9, %v951_v46 }
 0x3da   : > { %v962_v49 = vpop.permute.xlu1 %961 }
 0x3db   : > { %v899_v51 = vpop.permute.xlu0 %898  ;;  %v963_v37 = vrot.slane %v962_v49, 4 }
 0x3dd   : > { %v965_v55 = vsel %vm964_vm12, %v962_v49, %v963_v37 }
 0x3e2   : > { %v894_v38 = vpop.permute.xlu1 %893 }
 0x3e3   : > { %897 = vst.msk [vmem:[%s1706_s29] sm:$0xf] %vm896_vm1, %v894_v38  ;;  %v927_v52 = vpop.permute.xlu0 %926 }
 0x3e4   : > { %902 = vst.msk [vmem:[%s1706_s29] sm:$0xf] %vm901_vm7, %v899_v51  ;;  %v928_v50 = vrot.slane %v927_v52, 4 }
 0x3e5   : > { %907 = vst.msk [vmem:[%s1706_s29] sm:$0xf] %vm906_vm8, %v904_v42 }
 0x3e6   : > { %912 = vst.msk [vmem:[%s1706_s29] sm:$0xf] %vm911_vm9, %v909_v48  ;;  %v930_v56 = vsel %vm929_vm13, %v927_v52, %v928_v50 }
 0x3e7   : > { %917 = vst.msk [vmem:[%s1706_s29] sm:$0xf] %vm916_vm10, %v914_v53 }
 0x3ea   : > { %v919_v54 = vpop.permute.xlu1 %918 }
 0x3eb   : > { %922 = vst.msk [vmem:[%s1706_s29] sm:$0xf] %vm921_vm11, %v919_v54  ;;  %v955_v24 = vpop.permute.xlu0 %954 }
 0x3ec   : > { %957 = vst.msk [vmem:[%s1706_s29 + $0x4] sm:$0xf] %vm916_vm10, %v955_v24 }
 0x3ed   : > { %967 = vst.msk [vmem:[%s1706_s29 + $0x4] sm:$0xf] %vm921_vm11, %v965_v55 }
 0x3ee   : > { %933 = vst.msk [vmem:[%s1706_s29] sm:$0xf] %vm932_vm14, %v930_v56 }
 0x3ef   : > { %971 = vst.msk [vmem:[%s1706_s29 + $0x4] sm:$0xf] %vm932_vm14, %v969_v57 }
 0x3f0   : > { %1289 = shalt.err (!%p1286_p7)
}
 0x3f1   : > { %1082 = dma.vmem_to_hbm [thread:$0]  (%p1444_p11), %s987_s9, 128, %s989_s19, %s973_s21  }
 0x3f2 PF: > { %s1000_s18 = sand.u32 1, %s1316_s27   ;;  %p1089_p8 = pnand %p1061_p9, %p1448_p12 }
 0x3f3   : > { %s1001_s29 = scalar_lea.sflag [#allocation5], %s1000_s18 }
 0x3f4   : > { %p1090_p10 = pneg %p1089_p8 }
 0x3f6   : > { %1311 = dma.done.wait (%p1090_p10), %s1001_s29, 128  }
 0x3f7   : > { %1313 = vsyncadd (%p1090_p10), %s1001_s29, 4294967168  ;;  %s1799_s30 = sld [smem:[#allocation10_spill]]  ;;  %s1802_s27 = smov %s1320_s28 }
 0x3f8   : > { %s1800_s12 = sld [smem:[#allocation9_spill]] }
 0x3f9   : > { %s1801_s29 = sld [smem:[#allocation11_spill]] }
 0x3fd   : > { %p21_p0 = scmp.ge.s32.totalorder %s1799_s30, 4  }
 0x3fe   : > { %s1803_s28 = smov %s1800_s12 }
 0x3ff   :  { %23 = sbr.rel (!%p21_p0) target bundleno = 5 (0x5), region = 124 }
 0x404   :  { %1007 = vsyncpa [#allocation4], 1 }
 0x405   :  { %1009 = vsyncpa [#allocation4 + $0x1], 1 }
 0x406   :  { %1010 = vsyncpa [#allocation5], 1 }
 0x407   :  { %1012 = vsyncpa [#allocation5 + $0x1], 1 }

</bundles_post_ra>
